<compile_context>
chip_gen: v7x
topology: tpu7x:2x2x1
jax: 0.10.0
libtpu: 0.0.40
codegen_flags: <defaults>
</compile_context>

<pallas_src>
import functools

import jax
import jax.numpy as jnp
import numpy as np
from jax import lax
from jax.experimental import pallas as pl
from jax.experimental.pallas import tpu as pltpu


# ----------------------------------------------------------------------------
# Pallas kernel: group-wise correlation cost volume (build_gwc_volume)
# ----------------------------------------------------------------------------
def _gwc_kernel(left_ref, rpad_ref, gmat_ref, out_ref, *,
                d_total, d_blk, inv_cpg, lane_dense):
    # grid = (B, H // H_TILE, D // D_BLK); the D axis is innermost so the
    # left / padded-right tiles stay resident in VMEM across all disparities.
    dk = pl.program_id(2)
    W = left_ref.shape[1]
    HT = left_ref.shape[2]
    C = left_ref.shape[3]
    G = gmat_ref.shape[1]

    # Hoisted once per grid step, reused for every disparity in the block.
    # (f32 for the (W, HT, C) -> (W*HT, C) merge, which is exactly sublane
    # aligned for f32; the MXU operands are cast back to bf16.)
    left32 = left_ref[0].astype(jnp.float32).reshape(W * HT, C)
    gmat = gmat_ref[...]
    d_base = dk * d_blk

    for j in range(d_blk):                       # static unroll over D_BLK
        # rpad is zero-padded by (D-1) on the low-W side, so the window
        # starting at (D-1-d) is right[..., w-d] with zeros where w < d.
        start = (d_total - 1 - j) - d_base
        shifted32 = rpad_ref[0, pl.ds(start, W), :, :].astype(
            jnp.float32).reshape(W * HT, C)
        prod = (left32 * shifted32).astype(jnp.bfloat16)     # [W*HT, C]

        # Group-wise sum over channels == MXU matmul against an exact 0/1
        # group-membership matrix; divide by channels-per-group in f32.
        corr = jnp.dot(prod, gmat,
                       preferred_element_type=jnp.float32) * inv_cpg  # [W*HT, G]

        if lane_dense:
            # fold (HT, G) onto the lane axis -> unmasked, 128-multiple stores
            out_ref[0, j] = corr.reshape(W, HT * G)
        else:
            out_ref[0, j] = corr.reshape(W, HT, G)   # free major-axis split


def _gwc_static_config(C, H, W, D, G, vmem_budget_bytes=12 * 1024 * 1024):
    """Pick (H_TILE, D_BLK, vmem_limit_bytes) for the cost-volume kernel."""
    # Disparities per grid step: amortizes per-step overhead, keeps the left
    # tile reused across D_BLK shifts, and widens the output slab.
    d_blk = 1
    for t in range(min(D, 4), 0, -1):
        if D % t == 0:
            d_blk = t
            break

    # H tile: multiple of 8 (sublane) or full H, sized against a conservative
    # per-core VMEM budget so the kernel fits v7x (64 MiB physical / 32 MiB
    # scoped) as well as v5e/v6e.
    wp = W + D - 1
    per_h = (2 * (W + wp) * C * 2                # double-buffered bf16 inputs
             + 2 * d_blk * W * G * 4             # double-buffered f32 out block
             + d_blk * W * (C * 4 + G * 4))      # in-kernel temporaries
    cap = max(8, vmem_budget_bytes // max(per_h, 1))
    candidates = [t for t in range(H, 0, -1)
                  if H % t == 0 and (t % 8 == 0 or t == H)]
    h_tile = candidates[-1]
    for t in candidates:
        if t <= cap:
            h_tile = t
            break

    est = per_h * h_tile + 2 * C * G * 2 + 2 * W * h_tile * C * 4
    vmem_limit = int(min(max(2 * est, 8 << 20), 32 << 20))
    return h_tile, d_blk, vmem_limit


def _make_gwc_call(B, C, H, W, D, G, h_tile, d_blk, inv_cpg, lane_dense,
                   vmem_limit):
    """Build the pallas_call for given static shapes / tiling."""
    Wp = W + D - 1
    kernel = functools.partial(_gwc_kernel, d_total=D, d_blk=d_blk,
                               inv_cpg=inv_cpg, lane_dense=lane_dense)
    if lane_dense:
        # lane-dense store: out last dim = H_TILE*G (multiple of 128)
        out_shape = jax.ShapeDtypeStruct((B, D, W, H * G), jnp.float32)
        out_spec = pl.BlockSpec((1, d_blk, W, h_tile * G),
                                lambda b, ht, dk: (b, dk, 0, ht))
    else:
        out_shape = jax.ShapeDtypeStruct((B, D, W, H, G), jnp.float32)
        out_spec = pl.BlockSpec((1, d_blk, W, h_tile, G),
                                lambda b, ht, dk: (b, dk, 0, ht, 0))

    return pl.pallas_call(
        kernel,
        out_shape=out_shape,
        grid_spec=pltpu.PrefetchScalarGridSpec(
            num_scalar_prefetch=0,
            # D innermost: left/rpad block indices are D-invariant -> no re-DMA.
            grid=(B, H // h_tile, D // d_blk),
            in_specs=[
                pl.BlockSpec((1, W, h_tile, C), lambda b, ht, dk: (b, 0, ht, 0)),
                pl.BlockSpec((1, Wp, h_tile, C), lambda b, ht, dk: (b, 0, ht, 0)),
                # gmat block index is constant -> DMA'd once and kept resident.
                pl.BlockSpec((C, G), lambda b, ht, dk: (0, 0)),
            ],
            out_specs=out_spec,
        ),
        compiler_params=pltpu.CompilerParams(
            dimension_semantics=("parallel", "parallel", "arbitrary"),
            vmem_limit_bytes=vmem_limit),
    )


_LANE_DENSE_CACHE = {}


def gwc_lane_dense_supported(C, H, W, D, G):
    """Probe (must run OUTSIDE any jit trace) whether the lane-dense folded
    store ((H_TILE, G) -> H_TILE*G lanes) lowers on this Mosaic toolchain.
    The fold is a sublane->lane relayout of the MXU result; if unsupported we
    fall back to the always-supported G-minor store."""
    key = (C, H, W, D, G)
    if key in _LANE_DENSE_CACHE:
        return _LANE_DENSE_CACHE[key]
    ok = False
    try:
        h_tile, d_blk, vmem_limit = _gwc_static_config(C, H, W, D, G)
        call = _make_gwc_call(1, C, H, W, D, G, h_tile, d_blk,
                              float(G) / float(C), True, vmem_limit)
        l = jnp.zeros((1, W, H, C), jnp.bfloat16)
        r = jnp.zeros((1, W + D - 1, H, C), jnp.bfloat16)
        gm = jnp.zeros((C, G), jnp.bfloat16)
        jax.block_until_ready(call(l, r, gm))
        ok = True
    except Exception:
        ok = False
    _LANE_DENSE_CACHE[key] = ok
    return ok


def build_gwc_volume_pallas(left_fea, right_fea, maxdisp, num_groups,
                            lane_dense=False, compute_dtype=jnp.bfloat16):
    """left_fea, right_fea: [B, C, H, W] f32 -> [B, num_groups, maxdisp, H, W] f32."""
    B, C, H, W = left_fea.shape
    D = maxdisp
    G = num_groups
    assert C % num_groups == 0, "channels must be divisible by num_groups"
    cpg = C // num_groups

    h_tile, d_blk, vmem_limit = _gwc_static_config(C, H, W, D, G)

    # Kernel layout [B, W, H, C]: C on the lane axis, W a leading (non-tiled)
    # axis so the disparity shift is a cheap major-axis dynamic slice.
    # bf16 halves HBM DMA bytes / VMEM footprint and feeds the bf16 MXU path.
    left_t = jnp.transpose(left_fea.astype(compute_dtype), (0, 3, 2, 1))
    right_t = jnp.transpose(right_fea.astype(compute_dtype), (0, 3, 2, 1))
    rpad = jnp.pad(right_t, ((0, 0), (D - 1, 0), (0, 0), (0, 0)))
    # TODO(synk): the wrapper-side pad/transposes and the final 5-D transpose
    # still rewrite features / volume in HBM; emitting the backbone in NHWC and
    # fusing the output permutation into the 3-D-conv consumer would remove it.

    # Exact 0/1 group-membership matrix (bf16-representable); the 1/cpg scale
    # is applied to the f32 accumulator inside the kernel.
    gids = jnp.arange(C) // cpg
    gmat = (gids[:, None] == jnp.arange(G)[None, :]).astype(compute_dtype)

    call = _make_gwc_call(B, C, H, W, D, G, h_tile, d_blk, float(1.0 / cpg),
                          lane_dense, vmem_limit)
    out = call(left_t, rpad, gmat)
    if lane_dense:
        out = out.reshape(B, D, W, H, G)
    # back to torch layout [B, G, D, H, W]
    return jnp.transpose(out, (0, 4, 1, 3, 2))


# ----------------------------------------------------------------------------
# Pure-JAX reference of build_gwc_volume (torch semantics) for verification.
# ----------------------------------------------------------------------------
def build_gwc_volume_ref(left, right, maxdisp, num_groups, compute_dtype=None):
    """When compute_dtype is set, mirrors the kernel's precision: features and
    the elementwise product are rounded to compute_dtype, mean in f32."""
    B, C, H, W = left.shape
    cpg = C // num_groups
    if compute_dtype is not None:
        left = left.astype(compute_dtype).astype(jnp.float32)
        right = right.astype(compute_dtype).astype(jnp.float32)

    def _round(x):
        if compute_dtype is None:
            return x
        return x.astype(compute_dtype).astype(jnp.float32)

    vols = []
    for d in range(maxdisp):
        if d > 0:
            prod = _round(left[:, :, :, d:] * right[:, :, :, :-d])
            corr = prod.reshape(B, num_groups, cpg, H, W - d).mean(axis=2)
            corr = jnp.pad(corr, ((0, 0), (0, 0), (0, 0), (d, 0)))
        else:
            prod = _round(left * right)
            corr = prod.reshape(B, num_groups, cpg, H, W).mean(axis=2)
        vols.append(corr)
    return jnp.stack(vols, axis=2)


# ----------------------------------------------------------------------------
# feature_extraction backbone (convbn / BasicBlock) -- plain-JAX glue.
# ----------------------------------------------------------------------------
class ParamGen:
    def __init__(self, key):
        self.key = key
        self.count = 0

    def _next(self):
        self.count += 1
        return jax.random.fold_in(self.key, self.count)

    def conv(self, cin, cout, k):
        std = (2.0 / (cin * k * k)) ** 0.5
        return std * jax.random.normal(self._next(), (cout, cin, k, k), jnp.float32)

    def bn(self, c):
        return {
            'gamma': 1.0 + 0.1 * jax.random.normal(self._next(), (c,), jnp.float32),
            'beta': 0.1 * jax.random.normal(self._next(), (c,), jnp.float32),
            'mean': jnp.zeros((c,), jnp.float32),   # fresh running stats
            'var': jnp.ones((c,), jnp.float32),
        }


def _conv2d(x, w, stride, padding, dilation):
    return lax.conv_general_dilated(
        x, w, window_strides=(stride, stride),
        padding=((padding, padding), (padding, padding)),
        rhs_dilation=(dilation, dilation),
        dimension_numbers=('NCHW', 'OIHW', 'NCHW'))


def _batchnorm(x, p, eps=1e-5):
    inv = p['gamma'] / jnp.sqrt(p['var'] + eps)
    return x * inv[None, :, None, None] + (p['beta'] - p['mean'] * inv)[None, :, None, None]


def make_convbn(pg, cin, cout, k, stride, pad, dilation):
    return {'w': pg.conv(cin, cout, k), 'bn': pg.bn(cout),
            'stride': stride, 'pad': dilation if dilation > 1 else pad,
            'dilation': dilation}


def apply_convbn(p, x):
    x = _conv2d(x, p['w'], p['stride'], p['pad'], p['dilation'])
    return _batchnorm(x, p['bn'])


def make_basic_block(pg, inplanes, planes, stride, downsample, pad, dilation):
    p = {'conv1': make_convbn(pg, inplanes, planes, 3, stride, pad, dilation),
         'conv2': make_convbn(pg, planes, planes, 3, 1, pad, dilation),
         'downsample': None}
    if downsample:
        p['downsample'] = {'w': pg.conv(inplanes, planes, 1),
                           'bn': pg.bn(planes), 'stride': stride}
    return p


def apply_basic_block(p, x):
    out = jax.nn.relu(apply_convbn(p['conv1'], x))
    out = apply_convbn(p['conv2'], out)
    if p['downsample'] is not None:
        ds = p['downsample']
        x = _batchnorm(_conv2d(x, ds['w'], ds['stride'], 0, 1), ds['bn'])
    return x + out          # PSMNet/GwcNet BasicBlock: no ReLU after residual add


def make_layer(pg, inplanes, planes, blocks, stride, pad, dilation):
    layers = []
    downsample = (stride != 1 or inplanes != planes)
    layers.append(make_basic_block(pg, inplanes, planes, stride, downsample, pad, dilation))
    inplanes = planes
    for _ in range(1, blocks):
        layers.append(make_basic_block(pg, inplanes, planes, 1, False, pad, dilation))
    return layers, inplanes


def make_feature_extraction(pg):
    params = {}
    params['firstconv'] = [make_convbn(pg, 3, 32, 3, 2, 1, 1),
                           make_convbn(pg, 32, 32, 3, 1, 1, 1),
                           make_convbn(pg, 32, 32, 3, 1, 1, 1)]
    inplanes = 32
    params['layer1'], inplanes = make_layer(pg, inplanes, 32, 3, 1, 1, 1)
    params['layer2'], inplanes = make_layer(pg, inplanes, 64, 16, 2, 1, 1)
    params['layer3'], inplanes = make_layer(pg, inplanes, 128, 3, 1, 1, 1)
    params['layer4'], inplanes = make_layer(pg, inplanes, 128, 3, 1, 1, 2)
    return params


def apply_feature_extraction(params, x):
    for p in params['firstconv']:
        x = jax.nn.relu(apply_convbn(p, x))
    for p in params['layer1']:
        x = apply_basic_block(p, x)
    l2 = x
    for p in params['layer2']:
        l2 = apply_basic_block(p, l2)
    l3 = l2
    for p in params['layer3']:
        l3 = apply_basic_block(p, l3)
    l4 = l3
    for p in params['layer4']:
        l4 = apply_basic_block(p, l4)
    gwc_feature = jnp.concatenate([l2, l3, l4], axis=1)   # 64+128+128 = 320 channels
    return {'gwc_feature': gwc_feature}


# ----------------------------------------------------------------------------
# SimpleUp + stereo front-end forward (produces cv_module_volume for GWCDModule)
# ----------------------------------------------------------------------------
def simple_up(x, scale=2):
    # F.interpolate(scale_factor=scale, mode='bilinear', align_corners=False)
    B, C, H, W = x.shape
    return jax.image.resize(x, (B, C, H * scale, W * scale), method='bilinear')


def gwc_stereo_forward(params, data_dict, maxdisp, num_groups=32,
                       up_frame='leftframe', up_scale=2, return_features=False,
                       lane_dense=False):
    left = data_dict['leftframe']
    right = data_dict['rightframe']
    if up_frame == 'leftframe':
        left = simple_up(left, up_scale)
    elif up_frame == 'rightframe':
        right = simple_up(right, up_scale)
    fl = apply_feature_extraction(params, left)
    fr = apply_feature_extraction(params, right)
    # TODO(synk): use_concat_volume=True branch (concat_feature + build_concat_volume)
    # is not exercised here (default use_concat_volume=False).
    volume = build_gwc_volume_pallas(fl['gwc_feature'], fr['gwc_feature'],
                                     maxdisp // 4, num_groups,
                                     lane_dense=lane_dense)
    out = dict(data_dict)
    out['cv_module_volume'] = volume
    # TODO(synk): GWCDModule's 3-D encoder/decoder/predictor (Conv3DReLU /
    # Refine3D / PadSameConv3d) is not re-implemented: those submodule
    # definitions are not in the provided spec and 3-D convolutions are best
    # left to XLA's conv_general_dilated rather than a hand-written Pallas kernel.
    if return_features:
        return out, (fl['gwc_feature'], fr['gwc_feature'])
    return out


# ----------------------------------------------------------------------------
if __name__ == "__main__":
    key = jax.random.PRNGKey(0)
    k_left, k_right, k_params = jax.random.split(key, 3)

    B, H, W = 2, 32, 32
    maxdisp, num_groups = 16, 32
    # left frame arrives at half resolution and is upsampled 2x inside the module
    leftframe = jax.random.normal(k_left, (B, 3, H // 2, W // 2), dtype=jnp.float32)
    rightframe = jax.random.normal(k_right, (B, 3, H, W), dtype=jnp.float32)

    pg = ParamGen(k_params)
    params = make_feature_extraction(pg)

    # gwc features come out at 1/4 resolution with 64+128+128 = 320 channels.
    C_f, H_f, W_f, D_f = 320, H // 4, W // 4, maxdisp // 4
    # Feature-detect the lane-dense folded store OUTSIDE the jit trace; fall
    # back to the always-supported G-minor store otherwise.
    lane_dense = gwc_lane_dense_supported(C_f, H_f, W_f, D_f, num_groups)

    fwd = jax.jit(lambda l, r: gwc_stereo_forward(
        params, {'leftframe': l, 'rightframe': r}, maxdisp, num_groups,
        return_features=True, lane_dense=lane_dense))

    out_dict, (fl, fr) = fwd(leftframe, rightframe)
    volume = jax.block_until_ready(out_dict['cv_module_volume'])

    assert volume.shape == (B, num_groups, maxdisp // 4, H // 4, W // 4), volume.shape

    # Verify against the torch-semantics reference, mirroring the kernel's
    # bf16-product / f32-accumulate precision; atol is scaled to the volume's
    # dynamic range so the bf16 pipeline is judged fairly.
    ref = build_gwc_volume_ref(fl, fr, maxdisp // 4, num_groups,
                               compute_dtype=jnp.bfloat16)
    ref_np = np.asarray(ref)
    vol_np = np.asarray(volume)
    atol = 2e-2 * max(1.0, float(np.max(np.abs(ref_np))))
    np.testing.assert_allclose(vol_np, ref_np, rtol=2e-2, atol=atol)
    print("KERNEL_OK")
</pallas_src>

<mosaic_0001>
module attributes {stable_mosaic.version = 11 : i64} {
  func.func @_gwc_kernel(%arg0: i32, %arg1: i32, %arg2: i32, %arg3: memref<1x8x8x320xbf16, #tpu.memory_space<vmem>>, %arg4: memref<1x11x8x320xbf16, #tpu.memory_space<vmem>>, %arg5: memref<320x32xbf16, #tpu.memory_space<vmem>>, %arg6: memref<1x4x8x256xf32, #tpu.memory_space<vmem>>) attributes {dimension_semantics = [#tpu.dimension_semantics<parallel>, #tpu.dimension_semantics<parallel>, #tpu.dimension_semantics<arbitrary>], iteration_bounds = array<i64: 1, 1, 1>, scalar_prefetch = 0 : i64, scratch_operands = 0 : i64, tpu.core_type = #tpu.core_type<tc>, window_params = [{transform_indices = @transform_0, window_bounds = array<i64: 1, 8, 8, 320>}, {transform_indices = @transform_1, window_bounds = array<i64: 1, 11, 8, 320>}, {pipeline_mode = #tpu.pipeline_mode<synchronous>, transform_indices = @transform_2, window_bounds = array<i64: 320, 32>}, {transform_indices = @transform_3, window_bounds = array<i64: 1, 4, 8, 256>}]} {
    %c0 = arith.constant 0 : index
    %c0_0 = arith.constant 0 : index
    %c0_1 = arith.constant 0 : index
    %c0_2 = arith.constant 0 : index
    %0 = vector.load %arg3[%c0, %c0_0, %c0_1, %c0_2] : memref<1x8x8x320xbf16, #tpu.memory_space<vmem>>, vector<1x8x8x320xbf16>
    %1 = vector.shape_cast %0 : vector<1x8x8x320xbf16> to vector<8x8x320xbf16>
    %2 = arith.extf %1 : vector<8x8x320xbf16> to vector<8x8x320xf32>
    %3 = vector.shape_cast %2 : vector<8x8x320xf32> to vector<64x320xf32>
    %c0_3 = arith.constant 0 : index
    %c0_4 = arith.constant 0 : index
    %4 = vector.load %arg5[%c0_3, %c0_4] : memref<320x32xbf16, #tpu.memory_space<vmem>>, vector<320x32xbf16>
    %c4_i32 = arith.constant 4 : i32
    %5 = arith.muli %arg2, %c4_i32 : i32
    %c3_i32 = arith.constant 3 : i32
    %6 = arith.subi %c3_i32, %5 : i32
    %c0_5 = arith.constant 0 : index
    %7 = arith.index_cast %6 : i32 to index
    %c0_6 = arith.constant 0 : index
    %c0_7 = arith.constant 0 : index
    %8 = vector.load %arg4[%c0_5, %7, %c0_6, %c0_7] : memref<1x11x8x320xbf16, #tpu.memory_space<vmem>>, vector<1x8x8x320xbf16>
    %9 = vector.shape_cast %8 : vector<1x8x8x320xbf16> to vector<8x8x320xbf16>
    %10 = arith.extf %9 : vector<8x8x320xbf16> to vector<8x8x320xf32>
    %11 = vector.shape_cast %10 : vector<8x8x320xf32> to vector<64x320xf32>
    %12 = arith.mulf %3, %11 : vector<64x320xf32>
    %13 = arith.truncf %12 : vector<64x320xf32> to vector<64x320xbf16>
    %cst = arith.constant dense<0.000000e+00> : vector<64x32xf32>
    %14 = tpu.matmul %13, %4, %cst {dimension_numbers = #tpu.dot_dimension_numbers<[1], [0], [0], [1], [0, 0, 1, 1], [], []>} : vector<64x320xbf16>, vector<320x32xbf16>, vector<64x32xf32> -> vector<64x32xf32>
    %cst_8 = arith.constant 1.000000e-01 : f32
    %15 = vector.broadcast %cst_8 : f32 to vector<64x32xf32>
    %16 = arith.mulf %14, %15 : vector<64x32xf32>
    %17 = vector.shape_cast %16 : vector<64x32xf32> to vector<8x256xf32>
    %c0_9 = arith.constant 0 : index
    %c0_10 = arith.constant 0 : index
    %c0_11 = arith.constant 0 : index
    %c0_12 = arith.constant 0 : index
    %18 = vector.load %arg6[%c0_9, %c0_10, %c0_11, %c0_12] : memref<1x4x8x256xf32, #tpu.memory_space<vmem>>, vector<1x1x8x256xf32>
    %19 = vector.shape_cast %18 : vector<1x1x8x256xf32> to vector<8x256xf32>
    %20 = vector.shape_cast %17 : vector<8x256xf32> to vector<1x1x8x256xf32>
    tpu.vector_store %arg6[%c0_9, %c0_10, %c0_11, %c0_12], %20 {strides = array<i32>} : memref<1x4x8x256xf32, #tpu.memory_space<vmem>>, vector<1x1x8x256xf32>,
    %c2_i32 = arith.constant 2 : i32
    %21 = arith.subi %c2_i32, %5 : i32
    %c0_13 = arith.constant 0 : index
    %22 = arith.index_cast %21 : i32 to index
    %c0_14 = arith.constant 0 : index
    %c0_15 = arith.constant 0 : index
    %23 = vector.load %arg4[%c0_13, %22, %c0_14, %c0_15] : memref<1x11x8x320xbf16, #tpu.memory_space<vmem>>, vector<1x8x8x320xbf16>
    %24 = vector.shape_cast %23 : vector<1x8x8x320xbf16> to vector<8x8x320xbf16>
    %25 = arith.extf %24 : vector<8x8x320xbf16> to vector<8x8x320xf32>
    %26 = vector.shape_cast %25 : vector<8x8x320xf32> to vector<64x320xf32>
    %27 = arith.mulf %3, %26 : vector<64x320xf32>
    %28 = arith.truncf %27 : vector<64x320xf32> to vector<64x320xbf16>
    %cst_16 = arith.constant dense<0.000000e+00> : vector<64x32xf32>
    %29 = tpu.matmul %28, %4, %cst_16 {dimension_numbers = #tpu.dot_dimension_numbers<[1], [0], [0], [1], [0, 0, 1, 1], [], []>} : vector<64x320xbf16>, vector<320x32xbf16>, vector<64x32xf32> -> vector<64x32xf32>
    %cst_17 = arith.constant 1.000000e-01 : f32
    %30 = vector.broadcast %cst_17 : f32 to vector<64x32xf32>
    %31 = arith.mulf %29, %30 : vector<64x32xf32>
    %32 = vector.shape_cast %31 : vector<64x32xf32> to vector<8x256xf32>
    %c0_18 = arith.constant 0 : index
    %c1 = arith.constant 1 : index
    %c0_19 = arith.constant 0 : index
    %c0_20 = arith.constant 0 : index
    %33 = vector.load %arg6[%c0_18, %c1, %c0_19, %c0_20] : memref<1x4x8x256xf32, #tpu.memory_space<vmem>>, vector<1x1x8x256xf32>
    %34 = vector.shape_cast %33 : vector<1x1x8x256xf32> to vector<8x256xf32>
    %35 = vector.shape_cast %32 : vector<8x256xf32> to vector<1x1x8x256xf32>
    tpu.vector_store %arg6[%c0_18, %c1, %c0_19, %c0_20], %35 {strides = array<i32>} : memref<1x4x8x256xf32, #tpu.memory_space<vmem>>, vector<1x1x8x256xf32>,
    %c1_i32 = arith.constant 1 : i32
    %36 = arith.subi %c1_i32, %5 : i32
    %c0_21 = arith.constant 0 : index
    %37 = arith.index_cast %36 : i32 to index
    %c0_22 = arith.constant 0 : index
    %c0_23 = arith.constant 0 : index
    %38 = vector.load %arg4[%c0_21, %37, %c0_22, %c0_23] : memref<1x11x8x320xbf16, #tpu.memory_space<vmem>>, vector<1x8x8x320xbf16>
    %39 = vector.shape_cast %38 : vector<1x8x8x320xbf16> to vector<8x8x320xbf16>
    %40 = arith.extf %39 : vector<8x8x320xbf16> to vector<8x8x320xf32>
    %41 = vector.shape_cast %40 : vector<8x8x320xf32> to vector<64x320xf32>
    %42 = arith.mulf %3, %41 : vector<64x320xf32>
    %43 = arith.truncf %42 : vector<64x320xf32> to vector<64x320xbf16>
    %cst_24 = arith.constant dense<0.000000e+00> : vector<64x32xf32>
    %44 = tpu.matmul %43, %4, %cst_24 {dimension_numbers = #tpu.dot_dimension_numbers<[1], [0], [0], [1], [0, 0, 1, 1], [], []>} : vector<64x320xbf16>, vector<320x32xbf16>, vector<64x32xf32> -> vector<64x32xf32>
    %cst_25 = arith.constant 1.000000e-01 : f32
    %45 = vector.broadcast %cst_25 : f32 to vector<64x32xf32>
    %46 = arith.mulf %44, %45 : vector<64x32xf32>
    %47 = vector.shape_cast %46 : vector<64x32xf32> to vector<8x256xf32>
    %c0_26 = arith.constant 0 : index
    %c2 = arith.constant 2 : index
    %c0_27 = arith.constant 0 : index
    %c0_28 = arith.constant 0 : index
    %48 = vector.load %arg6[%c0_26, %c2, %c0_27, %c0_28] : memref<1x4x8x256xf32, #tpu.memory_space<vmem>>, vector<1x1x8x256xf32>
    %49 = vector.shape_cast %48 : vector<1x1x8x256xf32> to vector<8x256xf32>
    %50 = vector.shape_cast %47 : vector<8x256xf32> to vector<1x1x8x256xf32>
    tpu.vector_store %arg6[%c0_26, %c2, %c0_27, %c0_28], %50 {strides = array<i32>} : memref<1x4x8x256xf32, #tpu.memory_space<vmem>>, vector<1x1x8x256xf32>,
    %c0_i32 = arith.constant 0 : i32
    %51 = arith.subi %c0_i32, %5 : i32
    %c0_29 = arith.constant 0 : index
    %52 = arith.index_cast %51 : i32 to index
    %c0_30 = arith.constant 0 : index
    %c0_31 = arith.constant 0 : index
    %53 = vector.load %arg4[%c0_29, %52, %c0_30, %c0_31] : memref<1x11x8x320xbf16, #tpu.memory_space<vmem>>, vector<1x8x8x320xbf16>
    %54 = vector.shape_cast %53 : vector<1x8x8x320xbf16> to vector<8x8x320xbf16>
    %55 = arith.extf %54 : vector<8x8x320xbf16> to vector<8x8x320xf32>
    %56 = vector.shape_cast %55 : vector<8x8x320xf32> to vector<64x320xf32>
    %57 = arith.mulf %3, %56 : vector<64x320xf32>
    %58 = arith.truncf %57 : vector<64x320xf32> to vector<64x320xbf16>
    %cst_32 = arith.constant dense<0.000000e+00> : vector<64x32xf32>
    %59 = tpu.matmul %58, %4, %cst_32 {dimension_numbers = #tpu.dot_dimension_numbers<[1], [0], [0], [1], [0, 0, 1, 1], [], []>} : vector<64x320xbf16>, vector<320x32xbf16>, vector<64x32xf32> -> vector<64x32xf32>
    %cst_33 = arith.constant 1.000000e-01 : f32
    %60 = vector.broadcast %cst_33 : f32 to vector<64x32xf32>
    %61 = arith.mulf %59, %60 : vector<64x32xf32>
    %62 = vector.shape_cast %61 : vector<64x32xf32> to vector<8x256xf32>
    %c0_34 = arith.constant 0 : index
    %c3 = arith.constant 3 : index
    %c0_35 = arith.constant 0 : index
    %c0_36 = arith.constant 0 : index
    %63 = vector.load %arg6[%c0_34, %c3, %c0_35, %c0_36] : memref<1x4x8x256xf32, #tpu.memory_space<vmem>>, vector<1x1x8x256xf32>
    %64 = vector.shape_cast %63 : vector<1x1x8x256xf32> to vector<8x256xf32>
    %65 = vector.shape_cast %62 : vector<8x256xf32> to vector<1x1x8x256xf32>
    tpu.vector_store %arg6[%c0_34, %c3, %c0_35, %c0_36], %65 {strides = array<i32>} : memref<1x4x8x256xf32, #tpu.memory_space<vmem>>, vector<1x1x8x256xf32>,
    return
  }
  func.func @transform_0(%arg0: i32, %arg1: i32, %arg2: i32) -> (i32, i32, i32, i32) {
    %c0_i32 = arith.constant 0 : i32
    %c0_i32_0 = arith.constant 0 : i32
    %c0_i32_1 = arith.constant 0 : i32
    return %arg0, %c0_i32, %arg1, %c0_i32_0 : i32, i32, i32, i32
  }
  func.func @transform_1(%arg0: i32, %arg1: i32, %arg2: i32) -> (i32, i32, i32, i32) {
    %c0_i32 = arith.constant 0 : i32
    %c0_i32_0 = arith.constant 0 : i32
    %c0_i32_1 = arith.constant 0 : i32
    return %arg0, %c0_i32, %arg1, %c0_i32_0 : i32, i32, i32, i32
  }
  func.func @transform_2(%arg0: i32, %arg1: i32, %arg2: i32) -> (i32, i32) {
    %c0_i32 = arith.constant 0 : i32
    %c0_i32_0 = arith.constant 0 : i32
    %c0_i32_1 = arith.constant 0 : i32
    return %c0_i32, %c0_i32_0 : i32, i32
  }
  func.func @transform_3(%arg0: i32, %arg1: i32, %arg2: i32) -> (i32, i32, i32, i32) {
    %c0_i32 = arith.constant 0 : i32
    %c0_i32_0 = arith.constant 0 : i32
    return %arg0, %arg2, %c0_i32, %arg1 : i32, i32, i32, i32
  }
}

module attributes {stable_mosaic.version = 11 : i64} {
  func.func @_gwc_kernel(%arg0: i32, %arg1: i32, %arg2: i32, %arg3: memref<1x8x8x320xbf16, #tpu.memory_space<vmem>>, %arg4: memref<1x11x8x320xbf16, #tpu.memory_space<vmem>>, %arg5: memref<320x32xbf16, #tpu.memory_space<vmem>>, %arg6: memref<1x4x8x8x32xf32, #tpu.memory_space<vmem>>) attributes {dimension_semantics = [#tpu.dimension_semantics<parallel>, #tpu.dimension_semantics<parallel>, #tpu.dimension_semantics<arbitrary>], iteration_bounds = array<i64: 2, 1, 1>, scalar_prefetch = 0 : i64, scratch_operands = 0 : i64, tpu.core_type = #tpu.core_type<tc>, window_params = [{transform_indices = @transform_0, window_bounds = array<i64: 1, 8, 8, 320>}, {transform_indices = @transform_1, window_bounds = array<i64: 1, 11, 8, 320>}, {pipeline_mode = #tpu.pipeline_mode<synchronous>, transform_indices = @transform_2, window_bounds = array<i64: 320, 32>}, {transform_indices = @transform_3, window_bounds = array<i64: 1, 4, 8, 8, 32>}]} {
    %c0 = arith.constant 0 : index
    %c0_0 = arith.constant 0 : index
    %c0_1 = arith.constant 0 : index
    %c0_2 = arith.constant 0 : index
    %0 = vector.load %arg3[%c0, %c0_0, %c0_1, %c0_2] : memref<1x8x8x320xbf16, #tpu.memory_space<vmem>>, vector<1x8x8x320xbf16>
    %1 = vector.shape_cast %0 : vector<1x8x8x320xbf16> to vector<8x8x320xbf16>
    %2 = arith.extf %1 : vector<8x8x320xbf16> to vector<8x8x320xf32>
    %3 = vector.shape_cast %2 : vector<8x8x320xf32> to vector<64x320xf32>
    %c0_3 = arith.constant 0 : index
    %c0_4 = arith.constant 0 : index
    %4 = vector.load %arg5[%c0_3, %c0_4] : memref<320x32xbf16, #tpu.memory_space<vmem>>, vector<320x32xbf16>
    %c4_i32 = arith.constant 4 : i32
    %5 = arith.muli %arg2, %c4_i32 : i32
    %c3_i32 = arith.constant 3 : i32
    %6 = arith.subi %c3_i32, %5 : i32
    %c0_5 = arith.constant 0 : index
    %7 = arith.index_cast %6 : i32 to index
    %c0_6 = arith.constant 0 : index
    %c0_7 = arith.constant 0 : index
    %8 = vector.load %arg4[%c0_5, %7, %c0_6, %c0_7] : memref<1x11x8x320xbf16, #tpu.memory_space<vmem>>, vector<1x8x8x320xbf16>
    %9 = vector.shape_cast %8 : vector<1x8x8x320xbf16> to vector<8x8x320xbf16>
    %10 = arith.extf %9 : vector<8x8x320xbf16> to vector<8x8x320xf32>
    %11 = vector.shape_cast %10 : vector<8x8x320xf32> to vector<64x320xf32>
    %12 = arith.mulf %3, %11 : vector<64x320xf32>
    %13 = arith.truncf %12 : vector<64x320xf32> to vector<64x320xbf16>
    %cst = arith.constant dense<0.000000e+00> : vector<64x32xf32>
    %14 = tpu.matmul %13, %4, %cst {dimension_numbers = #tpu.dot_dimension_numbers<[1], [0], [0], [1], [0, 0, 1, 1], [], []>} : vector<64x320xbf16>, vector<320x32xbf16>, vector<64x32xf32> -> vector<64x32xf32>
    %cst_8 = arith.constant 1.000000e-01 : f32
    %15 = vector.broadcast %cst_8 : f32 to vector<64x32xf32>
    %16 = arith.mulf %14, %15 : vector<64x32xf32>
    %17 = vector.shape_cast %16 : vector<64x32xf32> to vector<8x8x32xf32>
    %c0_9 = arith.constant 0 : index
    %c0_10 = arith.constant 0 : index
    %c0_11 = arith.constant 0 : index
    %c0_12 = arith.constant 0 : index
    %c0_13 = arith.constant 0 : index
    %18 = vector.load %arg6[%c0_9, %c0_10, %c0_11, %c0_12, %c0_13] : memref<1x4x8x8x32xf32, #tpu.memory_space<vmem>>, vector<1x1x8x8x32xf32>
    %19 = vector.shape_cast %18 : vector<1x1x8x8x32xf32> to vector<8x8x32xf32>
    %20 = vector.shape_cast %17 : vector<8x8x32xf32> to vector<1x1x8x8x32xf32>
    tpu.vector_store %arg6[%c0_9, %c0_10, %c0_11, %c0_12, %c0_13], %20 {strides = array<i32>} : memref<1x4x8x8x32xf32, #tpu.memory_space<vmem>>, vector<1x1x8x8x32xf32>,
    %c2_i32 = arith.constant 2 : i32
    %21 = arith.subi %c2_i32, %5 : i32
    %c0_14 = arith.constant 0 : index
    %22 = arith.index_cast %21 : i32 to index
    %c0_15 = arith.constant 0 : index
    %c0_16 = arith.constant 0 : index
    %23 = vector.load %arg4[%c0_14, %22, %c0_15, %c0_16] : memref<1x11x8x320xbf16, #tpu.memory_space<vmem>>, vector<1x8x8x320xbf16>
    %24 = vector.shape_cast %23 : vector<1x8x8x320xbf16> to vector<8x8x320xbf16>
    %25 = arith.extf %24 : vector<8x8x320xbf16> to vector<8x8x320xf32>
    %26 = vector.shape_cast %25 : vector<8x8x320xf32> to vector<64x320xf32>
    %27 = arith.mulf %3, %26 : vector<64x320xf32>
    %28 = arith.truncf %27 : vector<64x320xf32> to vector<64x320xbf16>
    %cst_17 = arith.constant dense<0.000000e+00> : vector<64x32xf32>
    %29 = tpu.matmul %28, %4, %cst_17 {dimension_numbers = #tpu.dot_dimension_numbers<[1], [0], [0], [1], [0, 0, 1, 1], [], []>} : vector<64x320xbf16>, vector<320x32xbf16>, vector<64x32xf32> -> vector<64x32xf32>
    %cst_18 = arith.constant 1.000000e-01 : f32
    %30 = vector.broadcast %cst_18 : f32 to vector<64x32xf32>
    %31 = arith.mulf %29, %30 : vector<64x32xf32>
    %32 = vector.shape_cast %31 : vector<64x32xf32> to vector<8x8x32xf32>
    %c0_19 = arith.constant 0 : index
    %c1 = arith.constant 1 : index
    %c0_20 = arith.constant 0 : index
    %c0_21 = arith.constant 0 : index
    %c0_22 = arith.constant 0 : index
    %33 = vector.load %arg6[%c0_19, %c1, %c0_20, %c0_21, %c0_22] : memref<1x4x8x8x32xf32, #tpu.memory_space<vmem>>, vector<1x1x8x8x32xf32>
    %34 = vector.shape_cast %33 : vector<1x1x8x8x32xf32> to vector<8x8x32xf32>
    %35 = vector.shape_cast %32 : vector<8x8x32xf32> to vector<1x1x8x8x32xf32>
    tpu.vector_store %arg6[%c0_19, %c1, %c0_20, %c0_21, %c0_22], %35 {strides = array<i32>} : memref<1x4x8x8x32xf32, #tpu.memory_space<vmem>>, vector<1x1x8x8x32xf32>,
    %c1_i32 = arith.constant 1 : i32
    %36 = arith.subi %c1_i32, %5 : i32
    %c0_23 = arith.constant 0 : index
    %37 = arith.index_cast %36 : i32 to index
    %c0_24 = arith.constant 0 : index
    %c0_25 = arith.constant 0 : index
    %38 = vector.load %arg4[%c0_23, %37, %c0_24, %c0_25] : memref<1x11x8x320xbf16, #tpu.memory_space<vmem>>, vector<1x8x8x320xbf16>
    %39 = vector.shape_cast %38 : vector<1x8x8x320xbf16> to vector<8x8x320xbf16>
    %40 = arith.extf %39 : vector<8x8x320xbf16> to vector<8x8x320xf32>
    %41 = vector.shape_cast %40 : vector<8x8x320xf32> to vector<64x320xf32>
    %42 = arith.mulf %3, %41 : vector<64x320xf32>
    %43 = arith.truncf %42 : vector<64x320xf32> to vector<64x320xbf16>
    %cst_26 = arith.constant dense<0.000000e+00> : vector<64x32xf32>
    %44 = tpu.matmul %43, %4, %cst_26 {dimension_numbers = #tpu.dot_dimension_numbers<[1], [0], [0], [1], [0, 0, 1, 1], [], []>} : vector<64x320xbf16>, vector<320x32xbf16>, vector<64x32xf32> -> vector<64x32xf32>
    %cst_27 = arith.constant 1.000000e-01 : f32
    %45 = vector.broadcast %cst_27 : f32 to vector<64x32xf32>
    %46 = arith.mulf %44, %45 : vector<64x32xf32>
    %47 = vector.shape_cast %46 : vector<64x32xf32> to vector<8x8x32xf32>
    %c0_28 = arith.constant 0 : index
    %c2 = arith.constant 2 : index
    %c0_29 = arith.constant 0 : index
    %c0_30 = arith.constant 0 : index
    %c0_31 = arith.constant 0 : index
    %48 = vector.load %arg6[%c0_28, %c2, %c0_29, %c0_30, %c0_31] : memref<1x4x8x8x32xf32, #tpu.memory_space<vmem>>, vector<1x1x8x8x32xf32>
    %49 = vector.shape_cast %48 : vector<1x1x8x8x32xf32> to vector<8x8x32xf32>
    %50 = vector.shape_cast %47 : vector<8x8x32xf32> to vector<1x1x8x8x32xf32>
    tpu.vector_store %arg6[%c0_28, %c2, %c0_29, %c0_30, %c0_31], %50 {strides = array<i32>} : memref<1x4x8x8x32xf32, #tpu.memory_space<vmem>>, vector<1x1x8x8x32xf32>,
    %c0_i32 = arith.constant 0 : i32
    %51 = arith.subi %c0_i32, %5 : i32
    %c0_32 = arith.constant 0 : index
    %52 = arith.index_cast %51 : i32 to index
    %c0_33 = arith.constant 0 : index
    %c0_34 = arith.constant 0 : index
    %53 = vector.load %arg4[%c0_32, %52, %c0_33, %c0_34] : memref<1x11x8x320xbf16, #tpu.memory_space<vmem>>, vector<1x8x8x320xbf16>
    %54 = vector.shape_cast %53 : vector<1x8x8x320xbf16> to vector<8x8x320xbf16>
    %55 = arith.extf %54 : vector<8x8x320xbf16> to vector<8x8x320xf32>
    %56 = vector.shape_cast %55 : vector<8x8x320xf32> to vector<64x320xf32>
    %57 = arith.mulf %3, %56 : vector<64x320xf32>
    %58 = arith.truncf %57 : vector<64x320xf32> to vector<64x320xbf16>
    %cst_35 = arith.constant dense<0.000000e+00> : vector<64x32xf32>
    %59 = tpu.matmul %58, %4, %cst_35 {dimension_numbers = #tpu.dot_dimension_numbers<[1], [0], [0], [1], [0, 0, 1, 1], [], []>} : vector<64x320xbf16>, vector<320x32xbf16>, vector<64x32xf32> -> vector<64x32xf32>
    %cst_36 = arith.constant 1.000000e-01 : f32
    %60 = vector.broadcast %cst_36 : f32 to vector<64x32xf32>
    %61 = arith.mulf %59, %60 : vector<64x32xf32>
    %62 = vector.shape_cast %61 : vector<64x32xf32> to vector<8x8x32xf32>
    %c0_37 = arith.constant 0 : index
    %c3 = arith.constant 3 : index
    %c0_38 = arith.constant 0 : index
    %c0_39 = arith.constant 0 : index
    %c0_40 = arith.constant 0 : index
    %63 = vector.load %arg6[%c0_37, %c3, %c0_38, %c0_39, %c0_40] : memref<1x4x8x8x32xf32, #tpu.memory_space<vmem>>, vector<1x1x8x8x32xf32>
    %64 = vector.shape_cast %63 : vector<1x1x8x8x32xf32> to vector<8x8x32xf32>
    %65 = vector.shape_cast %62 : vector<8x8x32xf32> to vector<1x1x8x8x32xf32>
    tpu.vector_store %arg6[%c0_37, %c3, %c0_38, %c0_39, %c0_40], %65 {strides = array<i32>} : memref<1x4x8x8x32xf32, #tpu.memory_space<vmem>>, vector<1x1x8x8x32xf32>,
    return
  }
  func.func @transform_0(%arg0: i32, %arg1: i32, %arg2: i32) -> (i32, i32, i32, i32) {
    %c0_i32 = arith.constant 0 : i32
    %c0_i32_0 = arith.constant 0 : i32
    %c0_i32_1 = arith.constant 0 : i32
    return %arg0, %c0_i32, %arg1, %c0_i32_0 : i32, i32, i32, i32
  }
  func.func @transform_1(%arg0: i32, %arg1: i32, %arg2: i32) -> (i32, i32, i32, i32) {
    %c0_i32 = arith.constant 0 : i32
    %c0_i32_0 = arith.constant 0 : i32
    %c0_i32_1 = arith.constant 0 : i32
    return %arg0, %c0_i32, %arg1, %c0_i32_0 : i32, i32, i32, i32
  }
  func.func @transform_2(%arg0: i32, %arg1: i32, %arg2: i32) -> (i32, i32) {
    %c0_i32 = arith.constant 0 : i32
    %c0_i32_0 = arith.constant 0 : i32
    %c0_i32_1 = arith.constant 0 : i32
    return %c0_i32, %c0_i32_0 : i32, i32
  }
  func.func @transform_3(%arg0: i32, %arg1: i32, %arg2: i32) -> (i32, i32, i32, i32, i32) {
    %c0_i32 = arith.constant 0 : i32
    %c0_i32_0 = arith.constant 0 : i32
    %c0_i32_1 = arith.constant 0 : i32
    return %arg0, %arg2, %c0_i32, %arg1, %c0_i32_0 : i32, i32, i32, i32, i32
  }
}

</mosaic_0001>

<bundles_post_ra>
// kernel: _lambda_.1
= control target key start
LH: loop header
LB: loop body
LE: loop exit
PB: predicated region body
PF: predicated region fallthrough
CT: control target
= control target key end

     0   :  { %s2022_s12 = smov 0   ;;  %s2024_s13 = smov 0   ;;  %s2801_s0 = inlined_call_operand.vmem [shape: bf16[2,8,8,320], index: 0, kind: input, shape index: {}]   ;;  %s2802_s1 = inlined_call_operand.vmem [shape: bf16[2,11,8,320], index: 1, kind: input, shape index: {}]   ;;  %s2803_s2 = inlined_call_operand.vmem [shape: bf16[320,32], index: 2, kind: input, shape index: {}]   ;;  %s2804_s3 = inlined_call_operand.vmem [shape: f32[2,4,8,8,32], index: 3, kind: output, shape index: {}]  }
   0x1   :  { %s2026_s14 = smov 0  }
   0x2 LB: > { %s32_s15 = sadd.s32 1, %s1996_s13  ;;  %p1560_p0 = scmp.ge.s32.totalorder %s2000_s14, 1  ;;  %s2000_s14 = sphi %s2026_s14, %s13_s14   ;;  %s1996_s13 = sphi %s2024_s13, %s2987_s13   ;;  %s1992_s12 = sphi %s2022_s12, %s2986_s12  }
   0x3   : > { %p34_p1 = scmp.ge.s32.totalorder %s32_s15, 2  ;;  %p182_p2 = scmp.lt.s32.totalorder %s2000_s14, 3 }
   0x5   : > { %s2989_s15 = smov (%p34_p1, %s32_s15), 0  ;;  %p183_p3 = pnand %p1560_p0, %p182_p2 }
   0x7   : > { %186 = sbr.rel (%p183_p3) target bundleno = 374 (0x176), region = 32 }
   0xe   : > { %v2043_v0 = vld [vmem:[%s2803_s2 + $0x40] sm:$0xff]   ;;  %p227_p4 = scmp.lt.s32.totalorder %s1992_s12, 1  ;;  %v2062_v3 = vld [vmem:[%s2803_s2 + $0x48] sm:$0xff]   ;;  %v2082_v6 = vld [vmem:[%s2803_s2 + $0x50] sm:$0xff]   ;;  %vm541_vm0 = vcmask 523264   ;;  %vm692_vm1 = vcmask 261120  }
   0xf   : > { %2873 = vst [vmem:[#allocation2_spill] sm:$0xff] %v2043_v0  ;;  %v2048_v1 = vld [vmem:[%s2803_s2 + $0x80] sm:$0xff]   ;;  %1676 = vmatprep.subr.bf16.mxu0 %v2043_v0  ;;  %2875 = vst [vmem:[#allocation4_spill] sm:$0xff] %v2062_v3  ;;  %v2069_v4 = vld [vmem:[%s2803_s2 + $0x88] sm:$0xff]  }
  0x10   : > { %v2054_v2 = vld [vmem:[%s2803_s2] sm:$0xff]   ;;  %s2991_s12 = smov (!%p227_p4, %s1992_s12), 1  ;;  %1868 = vmatprep.subr.bf16.mxu1 %v2048_v1  ;;  %2876 = vst [vmem:[#allocation5_spill] sm:$0xff] %v2069_v4  ;;  %v2075_v5 = vld [vmem:[%s2803_s2 + $0x8] sm:$0xff]   ;;  %2878 = vst [vmem:[#allocation7_spill] sm:$0xff] %v2082_v6 }
  0x11   : > { %2874 = vst [vmem:[#allocation3_spill] sm:$0xff] %v2054_v2  ;;  %1677 = vmatpush3.bf16.msra.mxu0 %v2054_v2  ;;  %1869 = vmatpush3.bf16.msra.mxu1 %v2048_v1  ;;  %2877 = vst [vmem:[#allocation6_spill] sm:$0xff] %v2075_v5  ;;  %s1932_s28 = smul.u32 96, %s2991_s12  ;;  %v2088_v7 = vld [vmem:[%s2803_s2 + $0x90] sm:$0xff]   ;;  %v2102_v9 = vld [vmem:[%s2803_s2 + $0x58] sm:$0xff]   ;;  %s1675_s18 = sshll.u32 %s2991_s12, 8 }
  0x12   : > { %1678 = vmatprep.subr.bf16.mxu0 %v2062_v3  ;;  %1870 = vmatprep.subr.bf16.mxu1 %v2069_v4  ;;  %s1933_s4 = smul.u32 132, %s2991_s12  ;;  %2879 = vst [vmem:[#allocation8_spill] sm:$0xff] %v2088_v7  ;;  %v2095_v8 = vld [vmem:[%s2803_s2 + $0x10] sm:$0xff]   ;;  %2881 = vst [vmem:[#allocation10_spill] sm:$0xff] %v2102_v9  ;;  %v2107_v10 = vld [vmem:[%s2803_s2 + $0x98] sm:$0xff]   ;;  %s2726_s21 = scalar_lea.vmem %s2804_s3, %s1675_s18 }
  0x13   : > { %2880 = vst [vmem:[#allocation9_spill] sm:$0xff] %v2095_v8  ;;  %2882 = vst [vmem:[#allocation11_spill] sm:$0xff] %v2107_v10  ;;  %s2112_s19 = scalar_lea.vmem %s2801_s0, %s1932_s28  ;;  %v2122_v11 = vld [vmem:[%s2803_s2 + $0x18] sm:$0xff]   ;;  %v2129_v12 = vld [vmem:[%s2803_s2 + $0x60] sm:$0xff]  }
  0x14   : > { %s2117_s22 = scalar_lea.vmem %s2802_s1, %s1933_s4  ;;  %2883 = vst [vmem:[#allocation12_spill] sm:$0xff] %v2122_v11  ;;  %2884 = vst [vmem:[#allocation13_spill] sm:$0xff] %v2129_v12  ;;  %v261_v13 = vld [vmem:[%s2112_s19 + $0x8] ss:$12 sps:$4 sm:$0xff]   ;;  %v265_v19 = vld [vmem:[%s2112_s19 + $0x20] ss:$12 sps:$4 sm:$0xff]  }
  0x15   : > { %1679 = vmatpush3.bf16.msra.mxu0 %v2075_v5  ;;  %1871 = vmatpush3.bf16.msra.mxu1 %v2069_v4  ;;  %v1566_v14 = vld [vmem:[%s2117_s22 + $0x2c] ss:$12 sps:$4 sm:$0xff]   ;;  %v2135_v15 = vunpack.c.l.bf16 %v261_v13  ;;  %v2137_v16 = vunpack.c.h.bf16 %v261_v13  ;;  %v2140_v20 = vunpack.c.l.bf16 %v265_v19  ;;  %v2142_v21 = vunpack.c.h.bf16 %v265_v19  ;;  %v1570_v22 = vld [vmem:[%s2117_s22 + $0x44] ss:$12 sps:$4 sm:$0xff]   ;;  %v1569_v49 = vld [vmem:[%s2117_s22 + $0x3c] sm:$0xff] }
  0x16   : > { %1680 = vmatprep.subr.bf16.mxu0 %v2082_v6  ;;  %1872 = vmatprep.subr.bf16.mxu1 %v2088_v7  ;;  %v363_v17 = vunpack.c.l.bf16 %v1566_v14  ;;  %v366_v18 = vunpack.c.h.bf16 %v1566_v14  ;;  %v2152_v25 = vld [vmem:[%s2803_s2 + $0x20] sm:$0xff]   ;;  %v369_v26 = vunpack.c.l.bf16 %v1570_v22  ;;  %v372_v27 = vunpack.c.h.bf16 %v1570_v22  ;;  %v2159_v28 = vld [vmem:[%s2803_s2 + $0x68] sm:$0xff]   ;;  %v2174_v34 = vld [vmem:[%s2803_s2 + $0x70] sm:$0xff]  }
  0x17   : > { %2885 = vst [vmem:[#allocation14_spill] sm:$0xff] %v2152_v25  ;;  %2886 = vst [vmem:[#allocation15_spill] sm:$0xff] %v2159_v28  ;;  %v2168_v33 = vld [vmem:[%s2803_s2 + $0x28] sm:$0xff]   ;;  %v260_v35 = vld [vmem:[%s2112_s19] sm:$0xff]  ;;  %v2213_v54 = vunpack.c.h.bf16 %v1569_v49 }
  0x18   : > { %v387_v23 = vmul.f32 %v363_v17, %v2135_v15  ;;  %v390_v24 = vmul.f32 %v366_v18, %v2137_v16  ;;  %v393_v30 = vmul.f32 %v369_v26, %v2140_v20  ;;  %v396_v31 = vmul.f32 %v372_v27, %v2142_v21  ;;  %2887 = vst [vmem:[#allocation16_spill] sm:$0xff] %v2168_v33  ;;  %v262_v36 = vld [vmem:[%s2112_s19 + $0xc] sm:$0xff]  ;;  %v1565_v41 = vld [vmem:[%s2117_s22 + $0x24] sm:$0xff]  ;;  %v264_v43 = vld [vmem:[%s2112_s19 + $0x18] sm:$0xff] }
  0x19   : > { %1681 = vmatpush3.bf16.msra.mxu0 %v2095_v8  ;;  %1873 = vmatpush3.bf16.msra.mxu1 %v2088_v7  ;;  %2888 = vst [vmem:[#allocation17_spill] sm:$0xff] %v2174_v34  ;;  %v2179_v37 = vunpack.c.l.bf16 %v260_v35  ;;  %v2181_v38 = vunpack.c.h.bf16 %v260_v35  ;;  %v2183_v39 = vunpack.c.l.bf16 %v262_v36  ;;  %v2185_v40 = vunpack.c.h.bf16 %v262_v36  ;;  %v1567_v42 = vld [vmem:[%s2117_s22 + $0x30] sm:$0xff]  ;;  %v266_v48 = vld [vmem:[%s2112_s19 + $0x24] sm:$0xff]  ;;  %2893 = vst [vmem:[#allocation22_spill] sm:$0xff] %v2213_v54 }
  0x1a   : > { %1682 = vmatprep.subr.bf16.mxu0 %v2102_v9  ;;  %1874 = vmatprep.subr.bf16.mxu1 %v2107_v10  ;;  %v411_v29 = vpack.c.bf16 %v390_v24, %v387_v23  ;;  %v414_v32 = vpack.c.bf16 %v396_v31, %v393_v30  ;;  %v2191_v44 = vunpack.c.l.bf16 %v1565_v41  ;;  %v2193_v45 = vunpack.c.h.bf16 %v1565_v41  ;;  %v1571_v50 = vld [vmem:[%s2117_s22 + $0x48] sm:$0xff]  ;;  %v2207_v51 = vld [vmem:[%s2803_s2 + $0x30] sm:$0xff]   ;;  %v269_v56 = vld [vmem:[%s2112_s19 + $0x38] ss:$12 sps:$4 sm:$0xff]  }
  0x1b   : > { %2889 = vst [vmem:[#allocation18_spill] sm:$0xff] %v2183_v39  ;;  %2890 = vst [vmem:[#allocation19_spill] sm:$0xff] %v2185_v40  ;;  %v2195_v46 = vunpack.c.l.bf16 %v1567_v42  ;;  %v2197_v47 = vunpack.c.h.bf16 %v1567_v42  ;;  %v2209_v52 = vunpack.c.h.bf16 %v264_v43  ;;  %v2211_v53 = vunpack.c.h.bf16 %v266_v48  ;;  %v1574_v57 = vld [vmem:[%s2117_s22 + $0x5c] ss:$12 sps:$4 sm:$0xff]   ;;  %v1578_v22 = vld [vmem:[%s2117_s22 + $0x74] ss:$12 sps:$4 sm:$0xff]  }
  0x1c   : > { %1876 = vmatprep.mubr.msk.bf16.mxu1 %vm541_vm0, %v411_v29  ;;  %2891 = vst [vmem:[#allocation20_spill] sm:$0xff] %v2193_v45  ;;  %2892 = vst [vmem:[#allocation21_spill] sm:$0xff] %v2207_v51  ;;  %v2215_v55 = vunpack.c.h.bf16 %v1571_v50  ;;  %v2223_v58 = vld [vmem:[%s2803_s2 + $0x78] sm:$0xff]   ;;  %v386_v59 = vmul.f32 %v2193_v45, %v2181_v38  ;;  %v385_v61 = vmul.f32 %v2191_v44, %v2179_v37  ;;  %v2231_v62 = vunpack.c.l.bf16 %v269_v56  ;;  %v268_v30 = vld [vmem:[%s2112_s19 + $0x30] sm:$0xff] }
  0x1d   : > { %1683 = vmatpush3.bf16.msra.mxu0 %v2122_v11  ;;  %1875 = vmatpush3.bf16.msra.mxu1 %v2107_v10  ;;  %2894 = vst [vmem:[#allocation23_spill] sm:$0xff] %v2223_v58  ;;  %v389_v60 = vmul.f32 %v2197_v47, %v2185_v40  ;;  %v2233_v63 = vunpack.c.h.bf16 %v269_v56  ;;  %v273_v13 = vld [vmem:[%s2112_s19 + $0x50] ss:$12 sps:$4 sm:$0xff]   ;;  %v388_v17 = vmul.f32 %v2195_v46, %v2183_v39  ;;  %v375_v18 = vunpack.c.l.bf16 %v1574_v57  ;;  %v1573_v42 = vld [vmem:[%s2117_s22 + $0x54] sm:$0xff]  ;;  %v1575_v56 = vld [vmem:[%s2117_s22 + $0x60] sm:$0xff] }
  0x1e   : > { %1684 = vmatprep.subr.bf16.mxu0 %v2129_v12  ;;  %1724 = vmatprep.subr.bf16.mxu1 %v2043_v0  ;;  %v378_v19 = vunpack.c.h.bf16 %v1574_v57  ;;  %v2245_v23 = vld [vmem:[%s2803_s2 + $0x38] sm:$0xff]   ;;  %v392_v24 = vmul.f32 %v2213_v54, %v2209_v52  ;;  %v395_v26 = vmul.f32 %v2215_v55, %v2211_v53  ;;  %v2251_v27 = vunpack.c.l.bf16 %v264_v43 }
  0x1f   : > { %v410_v14 = vpack.c.bf16 %v389_v60, %v386_v59  ;;  %2895 = vst [vmem:[#allocation24_spill] sm:$0xff] %v2245_v23  ;;  %v2253_v29 = vunpack.c.l.bf16 %v266_v48  ;;  %v270_v31 = vld [vmem:[%s2112_s19 + $0x3c] sm:$0xff]  ;;  %v2260_v36 = vunpack.c.l.bf16 %v1569_v49  ;;  %v2262_v41 = vunpack.c.l.bf16 %v273_v13 }
  0x20   : > { %1877 = vmatmul.mubr.msk.bf16.vlgmr.msra.gmra.mrb[0].mxu1 %vm541_vm0, %v414_v32  ;;  %v399_v32 = vmul.f32 %v375_v18, %v2231_v62  ;;  %v402_v35 = vmul.f32 %v378_v19, %v2233_v63  ;;  %v2266_v43 = vunpack.c.l.bf16 %v1571_v50  ;;  %v2268_v57 = vunpack.c.h.bf16 %v273_v13  ;;  %v1605_v60 = vld [vmem:[%s2117_s22 + $0x18] sm:$0xff] }
  0x21   : > { %1685 = vmatpush3.bf16.msra.mxu0 %v2152_v25  ;;  %1725 = vmatpush3.bf16.msra.mxu1 %v2054_v2  ;;  %v381_v48 = vunpack.c.l.bf16 %v1578_v22  ;;  %v384_v59 = vunpack.c.h.bf16 %v1578_v22  ;;  %v2272_v18 = vunpack.c.h.bf16 %v268_v30  ;;  %v2274_v19 = vunpack.c.h.bf16 %v270_v31 }
  0x22   : > { %1686 = vmatprep.subr.bf16.mxu0 %v2159_v28  ;;  %1726 = vmatprep.subr.bf16.mxu1 %v2062_v3  ;;  %2896 = vst [vmem:[#allocation25_spill] sm:$0xff] %v2266_v43  ;;  %v2280_v13 = vunpack.c.h.bf16 %v1573_v42  ;;  %v2282_v22 = vunpack.c.h.bf16 %v1575_v56 }
  0x23   : > { %586 = vmatprep.mubr.bf16.mxu0 %v410_v14  ;;  %v409_v14 = vpack.c.bf16 %v388_v17, %v385_v61  ;;  %v405_v49 = vmul.f32 %v381_v48, %v2262_v41  ;;  %v408_v50 = vmul.f32 %v384_v59, %v2268_v57  ;;  %v413_v61 = vpack.c.bf16 %v395_v26, %v392_v24 }
  0x24   : > { %2897 = vst [vmem:[#allocation26_spill] sm:$0xff] %v2282_v22  ;;  %v2286_v17 = vunpack.c.h.bf16 %v1605_v60  ;;  %v749_v59 = vmul.f32 %v2193_v45, %v2185_v40  ;;  %v401_v24 = vmul.f32 %v2282_v22, %v2274_v19  ;;  %v1579_v45 = vld [vmem:[%s2117_s22 + $0x78] sm:$0xff]  ;;  %v2316_v40 = vunpack.c.l.bf16 %v1573_v42 }
  0x25   : > { %1687 = vmatpush3.bf16.msra.mxu0 %v2168_v33  ;;  %1727 = vmatpush3.bf16.msra.mxu1 %v2075_v5  ;;  %v420_v48 = vpack.c.bf16 %v408_v50, %v405_v49  ;;  %v272_v49 = vld [vmem:[%s2112_s19 + $0x48] sm:$0xff] }
  0x26   : > { %1688 = vmatprep.subr.bf16.mxu0 %v2174_v34  ;;  %1728 = vmatprep.subr.bf16.mxu1 %v2082_v6  ;;  %v417_v6 = vpack.c.bf16 %v402_v35, %v399_v32  ;;  %2898 = vst [vmem:[#allocation27_spill] sm:$0xff] %v2286_v17  ;;  %v391_v32 = vmul.f32 %v2260_v36, %v2251_v27  ;;  %2899 = vst [vmem:[#allocation28_spill] sm:$0xff] %v2316_v40 }
  0x27   : > { %v394_v35 = vmul.f32 %v2266_v43, %v2253_v29  ;;  %v746_v26 = vmul.f32 %v2286_v17, %v2181_v38 }
  0x28   : > { %1880 = vmatprep.mubr.msk.bf16.mxu1 %vm541_vm0, %v417_v6  ;;  %v398_v6 = vmul.f32 %v2280_v13, %v2272_v18 }
  0x29   : > { %1689 = vmatpush3.bf16.msra.mxu0 %v2207_v51  ;;  %1729 = vmatpush3.bf16.msra.mxu1 %v2095_v8  ;;  %v770_v50 = vpack.c.bf16 %v749_v59, %v746_v26  ;;  %v2311_v8 = vunpack.c.l.bf16 %v268_v30  ;;  %v2327_v59 = vunpack.c.l.bf16 %v1605_v60  ;;  %v1606_v26 = vld [vmem:[%s2117_s22 + $0x20] ss:$12 sps:$4 sm:$0xff]  }
  0x2a   : > { %1690 = vmatprep.subr.bf16.mxu0 %v2223_v58  ;;  %1730 = vmatprep.subr.bf16.mxu1 %v2102_v9  ;;  %v412_v9 = vpack.c.bf16 %v394_v35, %v391_v32  ;;  %v416_v17 = vpack.c.bf16 %v401_v24, %v398_v6  ;;  %v383_v35 = vunpack.c.h.bf16 %v1579_v45  ;;  %v752_v24 = vmul.f32 %v2197_v47, %v2209_v52 }
  0x2b   : > { %1881 = vmatmul.mubr.msk.bf16.gmra.mrb[4].mxu1 %vm541_vm0, %v420_v48  ;;  %v2322_v48 = vunpack.c.h.bf16 %v272_v49  ;;  %v745_v6 = vmul.f32 %v2327_v59, %v2179_v37 }
  0x2c   : > { %825 = vmatprep.mubr.bf16.mxu1 %v770_v50  ;;  %v2350_v50 = vunpack.c.l.bf16 %v272_v49  ;;  %v1610_v49 = vld [vmem:[%s2117_s22 + $0x38] ss:$12 sps:$4 sm:$0xff]  }
  0x2d   : > { %1691 = vmatpush3.bf16.msra.mxu0 %v2245_v23  ;;  %1731 = vmatpush3.bf16.msra.mxu1 %v2122_v11  ;;  %v274_v11 = vld [vmem:[%s2112_s19 + $0x54] sm:$0xff] }
  0x2e   : > { %1884 = vmatprep.subr.bf16.mxu0 %v2048_v1  ;;  %1732 = vmatprep.subr.bf16.mxu1 %v2129_v12  ;;  %v2314_v12 = vunpack.c.l.bf16 %v270_v31  ;;  %v2324_v32 = vunpack.c.h.bf16 %v274_v11  ;;  %v397_v31 = vmul.f32 %v2316_v40, %v2311_v8 }
  0x30   : > { %587 = vmatmul.mubr.bf16.vlgmr.msra.gmra.mrb[0].mxu0 %v409_v14  ;;  %v2307_v14 = vld [vmem:[%s2117_s22 + $0x6c] sm:$0xff]  ;;  %v407_v60 = vmul.f32 %v383_v35, %v2324_v32 }
  0x31   : > { %1885 = vmatpush3.bf16.msra.mxu0 %v2048_v1  ;;  %594 = vmatprep.mubr.bf16.mxu0 %v413_v61  ;;  %v2318_v61 = vunpack.c.l.bf16 %v1575_v56  ;;  %v2821_v30 = vunpack.c.h.bf16 %v2307_v14  ;;  %v2836_v35 = vunpack.c.l.bf16 %v2307_v14 }
  0x32   : > { %1886 = vmatprep.subr.bf16.mxu0 %v2069_v4  ;;  %1733 = vmatpush3.bf16.msra.mxu1 %v2152_v25  ;;  %v726_v25 = vunpack.c.h.bf16 %v1606_v26 }
  0x33   : > { %2900 = vst [vmem:[#allocation29_spill] sm:$0xff] %v2318_v61  ;;  %1734 = vmatprep.subr.bf16.mxu1 %v2159_v28  ;;  %v400_v42 = vmul.f32 %v2318_v61, %v2314_v12  ;;  %v404_v56 = vmul.f32 %v2821_v30, %v2322_v48  ;;  %v2352_v30 = vunpack.c.l.bf16 %v274_v11  ;;  %v723_v28 = vunpack.c.l.bf16 %v1606_v26 }
  0x34   : > { %v761_v26 = vmul.f32 %v2280_v13, %v2274_v19 }
  0x35   : > { %1887 = vmatpush3.bf16.msra.mxu0 %v2069_v4 }
  0x36   : > { %1888 = vmatprep.subr.bf16.mxu0 %v2088_v7  ;;  %1735 = vmatpush3.bf16.msra.mxu1 %v2168_v33  ;;  %v415_v33 = vpack.c.bf16 %v400_v42, %v397_v31  ;;  %v1614_v31 = vld [vmem:[%s2117_s22 + $0x50] ss:$12 sps:$4 sm:$0xff]   ;;  %v751_v42 = vmul.f32 %v2195_v46, %v2251_v27 }
  0x37   : > { %1736 = vmatprep.subr.bf16.mxu1 %v2174_v34  ;;  %v382_v34 = vunpack.c.l.bf16 %v1579_v45  ;;  %v403_v45 = vmul.f32 %v2836_v35, %v2350_v50  ;;  %v2384_v35 = vmul.f32 %v2266_v43, %v2311_v8 }
  0x38   : > { %595 = vmatmul.mubr.bf16.gmra.mrb[4].mxu0 %v412_v9  ;;  %v748_v9 = vmul.f32 %v2191_v44, %v2183_v39 }
  0x39   : > { %602 = vmatprep.mubr.bf16.mxu0 %v416_v17  ;;  %1889 = vmatpush3.bf16.msra.mxu0 %v2088_v7  ;;  %v755_v17 = vmul.f32 %v2213_v54, %v2211_v53  ;;  %v419_v7 = vpack.c.bf16 %v407_v60, %v404_v56  ;;  %v406_v54 = vmul.f32 %v382_v34, %v2352_v30 }
  0x3a   : > { %1890 = vmatprep.subr.bf16.mxu0 %v2107_v10  ;;  %1737 = vmatpush3.bf16.msra.mxu1 %v2207_v51  ;;  %v769_v11 = vpack.c.bf16 %v748_v9, %v745_v6  ;;  %v754_v56 = vmul.f32 %v2260_v36, %v2253_v29  ;;  %v2373_v60 = vmul.f32 %v2215_v55, %v2272_v18  ;;  %v1618_v6 = vld [vmem:[%s2117_s22 + $0x68] ss:$12 sps:$4 sm:$0xff]   ;;  %v2391_v51 = vld [vmem:[%s2117_s22 + $0xc] sm:$0xff] }
  0x3b   : > { %1738 = vmatprep.subr.bf16.mxu1 %v2223_v58  ;;  %v773_v4 = vpack.c.bf16 %v755_v17, %v752_v24  ;;  %v747_v34 = vmul.f32 %v723_v28, %v2135_v15  ;;  %v750_v9 = vmul.f32 %v726_v25, %v2137_v16  ;;  %v732_v24 = vunpack.c.h.bf16 %v1610_v49  ;;  %v1634_v17 = vld [vmem:[%s2117_s22 + $0x14] ss:$12 sps:$4 sm:$0xff]  }
  0x3c   : > { %v738_v58 = vunpack.c.h.bf16 %v1614_v31  ;;  %v741_v28 = vunpack.c.l.bf16 %v1618_v6  ;;  %v744_v25 = vunpack.c.h.bf16 %v1618_v6  ;;  %v772_v6 = vpack.c.bf16 %v754_v56, %v751_v42 }
  0x3d   : > { %1891 = vmatpush3.bf16.msra.mxu0 %v2107_v10  ;;  %v771_v10 = vpack.c.bf16 %v750_v9, %v747_v34  ;;  %v2419_v56 = vmul.f32 %v2318_v61, %v2350_v50  ;;  %v2904_v61 = vld [vmem:[#allocation19_spill] sm:$0xff] }
  0x3e   : > { %1900 = vmatprep.subr.bf16.mxu0 %v2048_v1  ;;  %1739 = vmatpush3.bf16.msra.mxu1 %v2245_v23  ;;  %v735_v23 = vunpack.c.l.bf16 %v1614_v31  ;;  %v965_v31 = vunpack.c.h.bf16 %v1634_v17  ;;  %v2411_v43 = vmul.f32 %v738_v58, %v2233_v63  ;;  %v2422_v34 = vmul.f32 %v741_v28, %v2262_v41 }
  0x3f   : > { %1772 = vmatprep.subr.bf16.mxu1 %v2043_v0  ;;  %v418_v0 = vpack.c.bf16 %v406_v54, %v403_v45  ;;  %v962_v45 = vunpack.c.l.bf16 %v1634_v17  ;;  %v1183_v17 = vld [vmem:[%s2117_s22] sm:$0xff] }
  0x40   : > { %603 = vmatmul.mubr.bf16.gmra.mrb[8].mxu0 %v415_v33  ;;  %v729_v33 = vunpack.c.l.bf16 %v1610_v49  ;;  %v2396_v49 = vmul.f32 %v2282_v22, %v2322_v48  ;;  %v2408_v22 = vmul.f32 %v735_v23, %v2231_v62  ;;  %v2425_v23 = vmul.f32 %v744_v25, %v2268_v57 }
  0x41   : > { %610 = vmatprep.mubr.bf16.mxu0 %v419_v7  ;;  %826 = vmatmul.mubr.bf16.vlgmr.msra.gmra.mrb[8].mxu1 %v769_v11  ;;  %v2388_v7 = vmul.f32 %v2316_v40, %v2314_v12  ;;  %v2901_v11 = vunpack.c.h.bf16 %v2307_v14  ;;  %v2434_v9 = vmul.f32 %v965_v31, %v2137_v16  ;;  %v2855_v25 = vunpack.c.l.bf16 %v2391_v51 }
  0x42   : > { %1773 = vmatpush3.bf16.msra.mxu1 %v2054_v2  ;;  %833 = vmatprep.mubr.bf16.mxu1 %v773_v4  ;;  %v753_v40 = vmul.f32 %v729_v33, %v2140_v20  ;;  %v756_v4 = vmul.f32 %v732_v24, %v2142_v21  ;;  %v776_v2 = vpack.c.bf16 %v761_v26, %v2373_v60  ;;  %v2437_v33 = vld [vmem:[%s2117_s22 + $0x2c] ss:$12 sps:$4 sm:$0xff]   ;;  %v1199_v58 = vunpack.c.l.bf16 %v1183_v17 }
  0x43   : > { %v2401_v54 = vmul.f32 %v2901_v11, %v2324_v32  ;;  %1774 = vmatprep.subr.bf16.mxu1 %v2062_v3  ;;  %v961_v11 = vunpack.c.h.bf16 %v2391_v51  ;;  %v2431_v60 = vmul.f32 %v962_v45, %v2135_v15  ;;  %v2902_v24 = vld [vmem:[#allocation7_spill] sm:$0xff]  ;;  %v777_v31 = vpack.c.bf16 %v2411_v43, %v2408_v22  ;;  %v2908_v22 = vld [vmem:[#allocation9_spill] sm:$0xff] }
  0x44   : > { %v774_v26 = vpack.c.bf16 %v756_v4, %v753_v40  ;;  %v1184_v45 = vld [vmem:[%s2117_s22 + $0x8] ss:$12 sps:$4 sm:$0xff]   ;;  %v1188_v40 = vld [vmem:[%s2117_s22 + $0x20] ss:$12 sps:$4 sm:$0xff]   ;;  %v2467_v43 = vmul.f32 %v2855_v25, %v2183_v39  ;;  %v1192_v39 = vld [vmem:[%s2117_s22 + $0x38] ss:$12 sps:$4 sm:$0xff]  }
  0x45   : > { %v2451_v42 = vmul.f32 %v961_v11, %v2181_v38  ;;  %v1201_v4 = vunpack.c.l.bf16 %v1184_v45  ;;  %v2478_v3 = vmul.f32 %v961_v11, %v2904_v61  ;;  %v2920_v25 = vld [vmem:[#allocation13_spill] sm:$0xff] }
  0x46   : > { %1775 = vmatpush3.bf16.msra.mxu1 %v2075_v5 }
  0x47   : > { %1776 = vmatprep.subr.bf16.mxu1 %v2902_v24  ;;  %v2905_v24 = vld [vmem:[#allocation27_spill] sm:$0xff] }
  0x48   : > { %611 = vmatmul.mubr.bf16.gmra.mrb[12].mxu0 %v418_v0  ;;  %v2903_v0 = vunpack.c.l.bf16 %v2307_v14  ;;  %v2455_v5 = vmul.f32 %v2905_v24, %v2904_v61  ;;  %2907 = vst [vmem:[#allocation27_spill] sm:$0xff] %v2467_v43 }
  0x49   : > { %1892 = vmatprep.mubr.msk.bf16.mxu0 %vm541_vm0, %v771_v10  ;;  %v1200_v10 = vunpack.c.h.bf16 %v1183_v17  ;;  %834 = vmatmul.mubr.bf16.gmra.mrb[12].mxu1 %v772_v6  ;;  %v2484_v6 = vmul.f32 %v1201_v4, %v2135_v15  ;;  %v1210_v17 = vunpack.c.h.bf16 %v1188_v40  ;;  %v2504_v15 = vmul.f32 %v2327_v59, %v2251_v27 }
  0x4a   : > { %v2444_v28 = vmul.f32 %v2903_v0, %v2352_v30  ;;  %v2462_v0 = vmul.f32 %v1199_v58, %v2179_v37  ;;  %1777 = vmatpush3.bf16.msra.mxu1 %v2908_v22  ;;  %841 = vmatprep.mubr.bf16.mxu1 %v776_v2  ;;  %v2909_v58 = vld [vmem:[#allocation10_spill] sm:$0xff]  ;;  %v1204_v22 = vunpack.c.h.bf16 %v1184_v45  ;;  %v1207_v2 = vunpack.c.l.bf16 %v1188_v40  ;;  %v2917_v40 = vld [vmem:[#allocation12_spill] sm:$0xff] }
  0x4b   : > { %v2474_v14 = vmul.f32 %v1200_v10, %v2181_v38  ;;  %1778 = vmatprep.subr.bf16.mxu1 %v2909_v58  ;;  %2910 = vst [vmem:[#allocation30_spill] sm:$0xff] %v2484_v6  ;;  %v2488_v38 = vmul.f32 %v2905_v24, %v2209_v52  ;;  %v2912_v10 = vld [vmem:[#allocation20_spill] sm:$0xff]  ;;  %2916 = vst [vmem:[#allocation34_spill] sm:$0xff] %v2504_v15  ;;  %v2510_v4 = vmul.f32 %v1210_v17, %v2142_v21  ;;  %v2922_v17 = vld [vmem:[#allocation22_spill] sm:$0xff] }
  0x4c   : > { %2906 = vst [vmem:[#allocation19_spill] sm:$0xff] %v2462_v0  ;;  %v2492_v58 = vmul.f32 %v2912_v10, %v2211_v53  ;;  %v2497_v11 = vmul.f32 %v1204_v22, %v2137_v16  ;;  %v2500_v45 = vmul.f32 %v1207_v2, %v2140_v20  ;;  %v1196_v24 = vld [vmem:[%s2117_s22 + $0x50] ss:$12 sps:$4 sm:$0xff]   ;;  %v2516_v22 = vmul.f32 %v2191_v44, %v2253_v29  ;;  %v2929_v15 = vld [vmem:[#allocation14_spill] sm:$0xff] }
  0x4d   : > { %2911 = vst [vmem:[#allocation31_spill] sm:$0xff] %v2488_v38  ;;  %2918 = vst [vmem:[#allocation12_spill] sm:$0xff] %v2510_v4  ;;  %v1213_v2 = vunpack.c.l.bf16 %v1192_v39  ;;  %v2528_v0 = vmul.f32 %v2922_v17, %v2274_v19  ;;  %v1216_v16 = vunpack.c.h.bf16 %v1192_v39  ;;  %v2924_v38 = vld [vmem:[#allocation5_spill] sm:$0xff]  ;;  %v2539_v6 = vmul.f32 %v2195_v46, %v2311_v8  ;;  %v2935_v4 = vld [vmem:[#allocation28_spill] sm:$0xff] }
  0x4e   : > { %2913 = vst [vmem:[#allocation20_spill] sm:$0xff] %v2492_v58  ;;  %2914 = vst [vmem:[#allocation32_spill] sm:$0xff] %v2497_v11  ;;  %1779 = vmatpush3.bf16.msra.mxu1 %v2917_v40  ;;  %v1642_v58 = vld [vmem:[%s2117_s22 + $0x44] ss:$12 sps:$4 sm:$0xff]   ;;  %v1219_v11 = vunpack.c.l.bf16 %v1196_v24 }
  0x4f   : > { %2915 = vst [vmem:[#allocation33_spill] sm:$0xff] %v2500_v45  ;;  %2919 = vst [vmem:[#allocation35_spill] sm:$0xff] %v2516_v22  ;;  %1780 = vmatprep.subr.bf16.mxu1 %v2920_v25  ;;  %v2926_v25 = vpack.c.bf16 %v2388_v7, %v2384_v35  ;;  %v2551_v43 = vmul.f32 %v1213_v2, %v2231_v62  ;;  %v2554_v61 = vmul.f32 %v1216_v16, %v2233_v63  ;;  %v2932_v16 = vld [vmem:[#allocation15_spill] sm:$0xff] }
  0x50   : > { %1893 = vmatmul.mubr.msk.bf16.vlgmr.msra.gmra.mrb[16].mxu0 %vm541_vm0, %v774_v26  ;;  %v2524_v26 = vmul.f32 %v2197_v47, %v2272_v18  ;;  %2923 = vst [vmem:[#allocation22_spill] sm:$0xff] %v2528_v0  ;;  %2925 = vst [vmem:[#allocation5_spill] sm:$0xff] %v2539_v6  ;;  %v2930_v22 = vpack.c.bf16 %v2401_v54, %v2396_v49  ;;  %v1222_v35 = vunpack.c.h.bf16 %v1196_v24  ;;  %v974_v39 = vunpack.c.l.bf16 %v1642_v58 }
  0x51   : > { %1901 = vmatpush3.bf16.msra.mxu0 %v2048_v1  ;;  %1896 = vmatprep.mubr.msk.bf16.mxu0 %vm541_vm0, %v777_v31  ;;  %v2548_v31 = vmul.f32 %v2260_v36, %v2314_v12  ;;  %2928 = vst [vmem:[#allocation38_spill] sm:$0xff] %v2551_v43  ;;  %v2561_v7 = vmul.f32 %v1219_v11, %v2262_v41  ;;  %v2933_v11 = vld [vmem:[#allocation25_spill] sm:$0xff]  ;;  %v2937_v43 = vld [vmem:[#allocation16_spill] sm:$0xff]  ;;  %v2939_v45 = vunpack.c.h.bf16 %v2437_v33 }
  0x52   : > { %2921 = vst [vmem:[#allocation36_spill] sm:$0xff] %v2524_v26  ;;  %1902 = vmatprep.subr.bf16.mxu0 %v2924_v38  ;;  %842 = vmatmul.mubr.bf16.gmra.mrb[16].mxu1 %v2926_v25  ;;  %v2565_v25 = vmul.f32 %v2215_v55, %v2322_v48  ;;  %v2569_v2 = vmul.f32 %v2280_v13, %v2324_v32  ;;  %v977_v26 = vunpack.c.h.bf16 %v1642_v58 }
  0x53   : > { %2927 = vst [vmem:[#allocation37_spill] sm:$0xff] %v2548_v31  ;;  %1781 = vmatpush3.bf16.msra.mxu1 %v2929_v15  ;;  %849 = vmatprep.mubr.bf16.mxu1 %v2930_v22  ;;  %v2579_v24 = vmul.f32 %v2933_v11, %v2350_v50  ;;  %v2934_v22 = vld [vmem:[#allocation8_spill] sm:$0xff]  ;;  %v2583_v0 = vmul.f32 %v1222_v35, %v2268_v57  ;;  %v2936_v31 = vunpack.c.l.bf16 %v2437_v33  ;;  %v2943_v33 = vunpack.c.l.bf16 %v2391_v51 }
  0x54   : > { %2931 = vst [vmem:[#allocation14_spill] sm:$0xff] %v2565_v25  ;;  %1782 = vmatprep.subr.bf16.mxu1 %v2932_v16  ;;  %v2589_v49 = vmul.f32 %v2935_v4, %v2352_v30  ;;  %v778_v54 = vpack.c.bf16 %v2444_v28, %v2419_v56  ;;  %v1009_v6 = vpack.c.bf16 %v2455_v5, %v2451_v42  ;;  %v2940_v42 = vld [vmem:[#allocation17_spill] sm:$0xff]  ;;  %v2941_v28 = vld [vmem:[#allocation11_spill] sm:$0xff] }
  0x55   : > { %1903 = vmatpush3.bf16.msra.mxu0 %v2924_v38  ;;  %v992_v58 = vmul.f32 %v2936_v31, %v2140_v20  ;;  %v2938_v35 = vpack.c.bf16 %v2425_v23, %v2422_v34  ;;  %v995_v25 = vmul.f32 %v2939_v45, %v2142_v21  ;;  %v1646_v20 = vld [vmem:[%s2117_s22 + $0x5c] ss:$12 sps:$4 sm:$0xff]   ;;  %v2942_v34 = vpack.c.bf16 %v2434_v9, %v2431_v60  ;;  %v2944_v31 = vld [vmem:[#allocation18_spill] sm:$0xff] }
  0x56   : > { %1904 = vmatprep.subr.bf16.mxu0 %v2934_v22  ;;  %v998_v21 = vmul.f32 %v974_v39, %v2231_v62  ;;  %v1001_v23 = vmul.f32 %v977_v26, %v2233_v63  ;;  %v984_v45 = vmul.f32 %v2943_v33, %v2179_v37  ;;  %v991_v5 = vmul.f32 %v2912_v10, %v2209_v52  ;;  %v2945_v56 = vld [vmem:[#allocation21_spill] sm:$0xff]  ;;  %v2946_v26 = vld [vmem:[#allocation23_spill] sm:$0xff]  ;;  %v2947_v37 = vld [vmem:[#allocation2_spill] sm:$0xff] }
  0x57   : > { %1783 = vmatpush3.bf16.msra.mxu1 %v2937_v43  ;;  %v1013_v60 = vpack.c.bf16 %v995_v25, %v992_v58  ;;  %v994_v62 = vmul.f32 %v2197_v47, %v2211_v53  ;;  %v980_v9 = vunpack.c.l.bf16 %v1646_v20  ;;  %v983_v63 = vunpack.c.h.bf16 %v1646_v20  ;;  %v2948_v39 = vld [vmem:[#allocation24_spill] sm:$0xff]  ;;  %v2949_v47 = vld [vmem:[#allocation3_spill] sm:$0xff] }
  0x58   : > { %1897 = vmatmul.mubr.msk.bf16.gmra.mrb[20].mxu0 %vm541_vm0, %v2938_v35  ;;  %1784 = vmatprep.subr.bf16.mxu1 %v2940_v42  ;;  %v987_v35 = vmul.f32 %v2327_v59, %v2944_v31  ;;  %v1016_v51 = vpack.c.bf16 %v1001_v23, %v998_v21  ;;  %v2950_v53 = vld [vmem:[#allocation4_spill] sm:$0xff]  ;;  %v990_v25 = vmul.f32 %v2191_v44, %v2251_v27  ;;  %v2952_v20 = vld [vmem:[#allocation7_spill] sm:$0xff]  ;;  %v2974_v23 = vld [vmem:[#allocation34_spill] sm:$0xff] }
  0x59   : > { %1905 = vmatpush3.bf16.msra.mxu0 %v2934_v22  ;;  %1908 = vmatprep.mubr.msk.bf16.mxu0 %vm541_vm0, %v2942_v34  ;;  %v1012_v52 = vpack.c.bf16 %v994_v62, %v991_v5  ;;  %v1007_v10 = vmul.f32 %v983_v63, %v2268_v57  ;;  %v1000_v57 = vmul.f32 %v2215_v55, %v2274_v19  ;;  %v2951_v5 = vld [vmem:[#allocation6_spill] sm:$0xff]  ;;  %v2973_v21 = vld [vmem:[#allocation35_spill] sm:$0xff]  ;;  %v2977_v31 = vld [vmem:[#allocation36_spill] sm:$0xff] }
  0x5a   : > { %1906 = vmatprep.subr.bf16.mxu0 %v2941_v28  ;;  %850 = vmatmul.mubr.bf16.gmra.mrb[20].mxu1 %v778_v54  ;;  %v1008_v59 = vpack.c.bf16 %v987_v35, %v984_v45  ;;  %v993_v54 = vmul.f32 %v2195_v46, %v2253_v29  ;;  %v2953_v46 = vld [vmem:[#allocation9_spill] sm:$0xff]  ;;  %v2954_v55 = vld [vmem:[#allocation10_spill] sm:$0xff]  ;;  %v996_v29 = vmul.f32 %v2260_v36, %v2311_v8 }
  0x5b   : > { %1785 = vmatpush3.bf16.msra.mxu1 %v2945_v56  ;;  %1064 = vmatprep.mubr.bf16.mxu1 %v1009_v6  ;;  %v1004_v6 = vmul.f32 %v980_v9, %v2262_v41  ;;  %v997_v41 = vmul.f32 %v2922_v17, %v2272_v18  ;;  %v999_v18 = vmul.f32 %v2933_v11, %v2314_v12  ;;  %v2958_v36 = vld [vmem:[#allocation29_spill] sm:$0xff]  ;;  %v2976_v45 = vld [vmem:[#allocation22_spill] sm:$0xff] }
  0x5c   : > { %1786 = vmatprep.subr.bf16.mxu1 %v2946_v26  ;;  %v1011_v44 = vpack.c.bf16 %v993_v54, %v990_v25  ;;  %v1003_v19 = vmul.f32 %v2280_v13, %v2322_v48  ;;  %v1002_v12 = vmul.f32 %v2935_v4, %v2350_v50  ;;  %v1005_v13 = vmul.f32 %v2958_v36, %v2352_v30  ;;  %v2962_v50 = vld [vmem:[#allocation27_spill] sm:$0xff]  ;;  %v2980_v62 = vld [vmem:[#allocation37_spill] sm:$0xff] }
  0x5d   : > { %1907 = vmatpush3.bf16.msra.mxu0 %v2941_v28  ;;  %v1019_v58 = vpack.c.bf16 %v1007_v10, %v1004_v6  ;;  %v1015_v27 = vpack.c.bf16 %v1000_v57, %v997_v41  ;;  %v2963_v30 = vld [vmem:[#allocation19_spill] sm:$0xff]  ;;  %v2975_v33 = vpack.c.bf16 %v2973_v21, %v2974_v23  ;;  %v2978_v35 = vpack.c.bf16 %v2976_v45, %v2977_v31  ;;  %v2981_v9 = vld [vmem:[#allocation5_spill] sm:$0xff] }
  0x5e   : > { %1820 = vmatprep.subr.bf16.mxu0 %v2947_v37  ;;  %v1017_v48 = vpack.c.bf16 %v1005_v13, %v1002_v12  ;;  %v2964_v4 = vpack.c.bf16 %v2962_v50, %v2963_v30  ;;  %v2982_v63 = vpack.c.bf16 %v2980_v62, %v2981_v9  ;;  %v2985_v37 = vpack.c.bf16 %v2589_v49, %v2579_v24 }
  0x5f   : > { %1787 = vmatpush3.bf16.msra.mxu1 %v2948_v39 }
  0x60   : > { %1909 = vmatmul.mubr.msk.bf16.vlgmr.msra.gmra.mrb[24].mxu0 %vm541_vm0, %v1013_v60  ;;  %1916 = vmatprep.subr.bf16.mxu1 %v2048_v1  ;;  %v2979_v60 = vpack.c.bf16 %v2583_v0, %v2561_v7 }
  0x61   : > { %1821 = vmatpush3.bf16.msra.mxu0 %v2949_v47  ;;  %1912 = vmatprep.mubr.msk.bf16.mxu0 %vm541_vm0, %v1016_v51 }
  0x62   : > { %1822 = vmatprep.subr.bf16.mxu0 %v2950_v53  ;;  %1065 = vmatmul.mubr.bf16.vlgmr.msra.gmra.mrb[24].mxu1 %v1008_v59 }
  0x63   : > { %1072 = vmatprep.mubr.bf16.mxu1 %v1012_v52  ;;  %1917 = vmatpush3.bf16.msra.mxu1 %v2048_v1  ;;  %v2955_v1 = vpack.c.bf16 %v2478_v3, %v2474_v14  ;;  %v2957_v3 = vld [vmem:[#allocation13_spill] sm:$0xff]  ;;  %v1014_v14 = vpack.c.bf16 %v999_v18, %v996_v29 }
  0x64   : > { %1918 = vmatprep.subr.bf16.mxu1 %v2924_v38 }
  0x65   : > { %1823 = vmatpush3.bf16.msra.mxu0 %v2951_v5 }
  0x66   : > { %1824 = vmatprep.subr.bf16.mxu0 %v2952_v20 }
  0x67   : > { %1919 = vmatpush3.bf16.msra.mxu1 %v2924_v38  ;;  %v2956_v38 = vld [vmem:[#allocation26_spill] sm:$0xff] }
  0x68   : > { %1913 = vmatmul.mubr.msk.bf16.gmra.mrb[28].mxu0 %vm541_vm0, %v1019_v58  ;;  %1920 = vmatprep.subr.bf16.mxu1 %v2934_v22  ;;  %v1006_v17 = vmul.f32 %v2956_v38, %v2324_v32  ;;  %v2959_v32 = vld [vmem:[#allocation32_spill] sm:$0xff] }
  0x69   : > { %1825 = vmatpush3.bf16.msra.mxu0 %v2953_v46  ;;  %1303 = vmatprep.mubr.bf16.mxu0 %v2955_v1 }
  0x6a   : > { %1826 = vmatprep.subr.bf16.mxu0 %v2954_v55  ;;  %1073 = vmatmul.mubr.bf16.gmra.mrb[28].mxu1 %v1011_v44  ;;  %v1018_v8 = vpack.c.bf16 %v1006_v17, %v1003_v19 }
  0x6b   : > { %1080 = vmatprep.mubr.bf16.mxu1 %v1015_v27  ;;  %1921 = vmatpush3.bf16.msra.mxu1 %v2934_v22  ;;  %v2968_v22 = vld [vmem:[#allocation12_spill] sm:$0xff] }
  0x6c   : > { %1922 = vmatprep.subr.bf16.mxu1 %v2941_v28 }
  0x6d   : > { %1827 = vmatpush3.bf16.msra.mxu0 %v2917_v40 }
  0x6e   : > { %1828 = vmatprep.subr.bf16.mxu0 %v2957_v3 }
  0x6f   : > { %1923 = vmatpush3.bf16.msra.mxu1 %v2941_v28  ;;  %v2971_v28 = vld [vmem:[#allocation38_spill] sm:$0xff] }
  0x70   : > { %v2972_v34 = vpack.c.bf16 %v2554_v61, %v2971_v28  ;;  %v2983_v61 = vld [vmem:[#allocation14_spill] sm:$0xff] }
  0x71   : > { %1829 = vmatpush3.bf16.msra.mxu0 %v2929_v15  ;;  %v2960_v15 = vld [vmem:[#allocation30_spill] sm:$0xff] }
  0x72   : > { %1830 = vmatprep.subr.bf16.mxu0 %v2932_v16  ;;  %1081 = vmatmul.mubr.bf16.gmra.mrb[32].mxu1 %v1014_v14  ;;  %v2961_v40 = vpack.c.bf16 %v2959_v32, %v2960_v15  ;;  %v2966_v16 = vld [vmem:[#allocation31_spill] sm:$0xff] }
  0x73   : > { %1088 = vmatprep.mubr.bf16.mxu1 %v1018_v8 }
  0x75   : > { %1831 = vmatpush3.bf16.msra.mxu0 %v2937_v43  ;;  %v2965_v43 = vld [vmem:[#allocation20_spill] sm:$0xff] }
  0x76   : > { %1832 = vmatprep.subr.bf16.mxu0 %v2940_v42  ;;  %v2967_v11 = vpack.c.bf16 %v2965_v43, %v2966_v16 }
  0x79   : > { %1833 = vmatpush3.bf16.msra.mxu0 %v2945_v56  ;;  %v2969_v56 = vld [vmem:[#allocation33_spill] sm:$0xff] }
  0x7a   : > { %1834 = vmatprep.subr.bf16.mxu0 %v2946_v26  ;;  %1089 = vmatmul.mubr.bf16.gmra.mrb[36].mxu1 %v1017_v48  ;;  %v2970_v42 = vpack.c.bf16 %v2968_v22, %v2969_v56  ;;  %v2984_v26 = vpack.c.bf16 %v2569_v2, %v2983_v61 }
  0x7b   : > { %1924 = vmatprep.mubr.msk.bf16.mxu1 %vm541_vm0, %v2961_v40 }
  0x7d   : > { %1835 = vmatpush3.bf16.msra.mxu0 %v2948_v39 }
  0x80   : > { %1304 = vmatmul.mubr.bf16.vlgmr.msra.gmra.mrb[32].mxu0 %v2964_v4 }
  0x81   : > { %1311 = vmatprep.mubr.bf16.mxu0 %v2967_v11 }
  0x82   : > { %1925 = vmatmul.mubr.msk.bf16.vlgmr.msra.gmra.mrb[40].mxu1 %vm541_vm0, %v2970_v42 }
  0x83   : > { %1928 = vmatprep.mubr.msk.bf16.mxu1 %vm541_vm0, %v2972_v34 }
  0x88   : > { %1312 = vmatmul.mubr.bf16.gmra.mrb[36].mxu0 %v2975_v33 }
  0x89   : > { %1319 = vmatprep.mubr.bf16.mxu0 %v2978_v35 }
  0x8a   : > { %1929 = vmatmul.mubr.msk.bf16.gmra.mrb[44].mxu1 %vm541_vm0, %v2979_v60 }
  0x90   : > { %1320 = vmatmul.mubr.bf16.gmra.mrb[40].mxu0 %v2982_v63 }
  0x91   : > { %1327 = vmatprep.mubr.bf16.mxu0 %v2984_v26 }
  0x98   : > { %1328 = vmatmul.mubr.bf16.gmra.mrb[44].mxu0 %v2985_v37 }
  0xf3   : > { %v1878_v51 = vpop.f32.mrb[0].mxu1 }
  0xf4   : > { %v653_v59 = vpop.f32.mrb[1].mxu1 }
  0xf5   : > { %v1879_v39 = vpop.f32.mrb[2].mxu1 }
  0xf6   : > { %v656_v52 = vpop.f32.mrb[3].mxu1 }
  0xfe   : > { %v1882_v47 = vpop.f32.mrb[4].mxu1 }
  0xff   : > { %v669_v25 = vpop.f32.mrb[5].mxu1 }
 0x100   : > { %v1883_v2 = vpop.f32.mrb[6].mxu1 }
 0x101   : > { %v672_v49 = vpop.f32.mrb[7].mxu1 }
 0x103   : > { %v1692_v6 = vpop.f32.mrb[0].mxu0 }
 0x104   : > { %v1693_v0 = vpop.f32.mrb[1].mxu0 }
 0x105   : > { %v1694_v7 = vadd.f32 %v1693_v0, %v1692_v6  ;;  %v1695_v10 = vpop.f32.mrb[2].mxu0 }
 0x106   : > { %v1696_v53 = vpop.f32.mrb[3].mxu0 }
 0x107   : > { %v654_v54 = vadd.f32 %v1694_v7, %v653_v59  ;;  %v1697_v41 = vadd.f32 %v1696_v53, %v1695_v10 }
 0x109   : > { %v684_v24 = vmul.f32 0.1, %v654_v54  ;;  %v657_v57 = vadd.f32 %v1697_v41, %v656_v52 }
 0x10b   : > { %693 = vst.msk [vmem:[%s2726_s21] sm:$0xff] %vm692_vm1, %v684_v24  ;;  %v685_v58 = vmul.f32 0.1, %v657_v57  ;;  %v1698_v5 = vpop.f32.mrb[4].mxu0 }
 0x10c   : > { %v1699_v20 = vpop.f32.mrb[5].mxu0 }
 0x10d   : > { %694 = vst.msk [vmem:[%s2726_s21 + $0x8] sm:$0xff] %vm692_vm1, %v685_v58  ;;  %v1700_v44 = vadd.f32 %v1699_v20, %v1698_v5  ;;  %v1701_v27 = vpop.f32.mrb[6].mxu0 }
 0x10e   : > { %v1702_v46 = vpop.f32.mrb[7].mxu0 }
 0x10f   : > { %v662_v55 = vadd.f32 %v1878_v51, %v1700_v44  ;;  %v1703_v1 = vadd.f32 %v1702_v46, %v1701_v27 }
 0x111   : > { %v686_v29 = vmul.f32 0.1, %v662_v55  ;;  %v665_v18 = vadd.f32 %v1879_v39, %v1703_v1 }
 0x113   : > { %695 = vst.msk [vmem:[%s2726_s21 + $0x10] sm:$0xff] %vm692_vm1, %v686_v29  ;;  %v687_v19 = vmul.f32 0.1, %v665_v18  ;;  %v1704_v38 = vpop.f32.mrb[8].mxu0 }
 0x114   : > { %v1705_v17 = vpop.f32.mrb[9].mxu0  ;;  %v1740_v12 = vpop.f32.mrb[8].mxu1 }
 0x115   : > { %696 = vst.msk [vmem:[%s2726_s21 + $0x18] sm:$0xff] %vm692_vm1, %v687_v19  ;;  %v1706_v3 = vadd.f32 %v1705_v17, %v1704_v38  ;;  %v1707_v14 = vpop.f32.mrb[10].mxu0  ;;  %v1741_v48 = vpop.f32.mrb[9].mxu1 }
 0x116   : > { %v1708_v8 = vpop.f32.mrb[11].mxu0  ;;  %v1742_v32 = vadd.f32 %v1741_v48, %v1740_v12  ;;  %v1743_v15 = vpop.f32.mrb[10].mxu1 }
 0x117   : > { %v1709_v36 = vadd.f32 %v1708_v8, %v1707_v14  ;;  %v670_v13 = vadd.f32 %v1706_v3, %v669_v25  ;;  %v1744_v30 = vpop.f32.mrb[11].mxu1 }
 0x118   : > { %v1745_v4 = vadd.f32 %v1744_v30, %v1743_v15 }
 0x119   : > { %v688_v40 = vmul.f32 0.1, %v670_v13  ;;  %v673_v50 = vadd.f32 %v1709_v36, %v672_v49 }
 0x11b   : > { %697 = vst.msk [vmem:[%s2726_s21 + $0x20] sm:$0xff] %vm692_vm1, %v688_v40  ;;  %v689_v43 = vmul.f32 0.1, %v673_v50  ;;  %v1710_v16 = vpop.f32.mrb[12].mxu0 }
 0x11c   : > { %v1711_v11 = vpop.f32.mrb[13].mxu0  ;;  %v1746_v28 = vpop.f32.mrb[12].mxu1 }
 0x11d   : > { %698 = vst.msk [vmem:[%s2726_s21 + $0x28] sm:$0xff] %vm692_vm1, %v689_v43  ;;  %v1712_v22 = vadd.f32 %v1711_v11, %v1710_v16  ;;  %v1713_v56 = vpop.f32.mrb[14].mxu0  ;;  %v1747_v23 = vpop.f32.mrb[13].mxu1 }
 0x11e   : > { %v1714_v42 = vpop.f32.mrb[15].mxu0  ;;  %v1748_v33 = vadd.f32 %v1747_v23, %v1746_v28  ;;  %v1749_v45 = vpop.f32.mrb[14].mxu1 }
 0x11f   : > { %v678_v34 = vadd.f32 %v1882_v47, %v1712_v22  ;;  %v1715_v21 = vadd.f32 %v1714_v42, %v1713_v56  ;;  %v1750_v60 = vpop.f32.mrb[15].mxu1 }
 0x120   : > { %v1751_v62 = vadd.f32 %v1750_v60, %v1749_v45 }
 0x121   : > { %v690_v31 = vmul.f32 0.1, %v678_v34  ;;  %v681_v35 = vadd.f32 %v1883_v2, %v1715_v21 }
 0x123   : > { %699 = vst.msk [vmem:[%s2726_s21 + $0x30] sm:$0xff] %vm692_vm1, %v690_v31  ;;  %v691_v9 = vmul.f32 0.1, %v681_v35  ;;  %v1894_v63 = vpop.f32.mrb[16].mxu0 }
 0x124   : > { %v901_v61 = vadd.f32 %v1894_v63, %v1748_v33  ;;  %v892_v26 = vpop.f32.mrb[17].mxu0 }
 0x125   : > { %700 = vst.msk [vmem:[%s2726_s21 + $0x38] sm:$0xff] %vm692_vm1, %v691_v9  ;;  %v893_v37 = vadd.f32 %v1742_v32, %v892_v26  ;;  %v1895_v51 = vpop.f32.mrb[18].mxu0  ;;  %v1752_v6 = vpop.f32.mrb[16].mxu1 }
 0x126   : > { %v925_v59 = vmul.f32 0.1, %v901_v61  ;;  %v904_v39 = vadd.f32 %v1895_v51, %v1751_v62  ;;  %v895_v52 = vpop.f32.mrb[19].mxu0  ;;  %v1753_v10 = vpop.f32.mrb[17].mxu1 }
 0x127   : > { %v923_v0 = vmul.f32 0.1, %v893_v37  ;;  %v896_v7 = vadd.f32 %v1745_v4, %v895_v52  ;;  %v1754_v53 = vadd.f32 %v1753_v10, %v1752_v6  ;;  %v1755_v25 = vpop.f32.mrb[18].mxu1 }
 0x128   : > { %1627 = vst.msk [vmem:[%s2726_s21 + $0x50] sm:$0xff] %vm692_vm1, %v925_v59  ;;  %v926_v47 = vmul.f32 0.1, %v904_v39  ;;  %v1756_v41 = vpop.f32.mrb[19].mxu1 }
 0x129   : > { %1625 = vst.msk [vmem:[%s2726_s21 + $0x40] sm:$0xff] %vm692_vm1, %v923_v0  ;;  %v924_v54 = vmul.f32 0.1, %v896_v7  ;;  %v1757_v2 = vadd.f32 %v1756_v41, %v1755_v25 }
 0x12a   : > { %1628 = vst.msk [vmem:[%s2726_s21 + $0x58] sm:$0xff] %vm692_vm1, %v926_v47 }
 0x12b   : > { %1626 = vst.msk [vmem:[%s2726_s21 + $0x48] sm:$0xff] %vm692_vm1, %v924_v54  ;;  %v1898_v49 = vpop.f32.mrb[20].mxu0 }
 0x12c   : > { %v908_v24 = vpop.f32.mrb[21].mxu0 }
 0x12d   : > { %v909_v57 = vadd.f32 %v1754_v53, %v908_v24  ;;  %v1899_v58 = vpop.f32.mrb[22].mxu0  ;;  %v1758_v5 = vpop.f32.mrb[20].mxu1 }
 0x12e   : > { %v911_v20 = vpop.f32.mrb[23].mxu0  ;;  %v1759_v44 = vpop.f32.mrb[21].mxu1 }
 0x12f   : > { %v927_v27 = vmul.f32 0.1, %v909_v57  ;;  %v912_v46 = vadd.f32 %v1757_v2, %v911_v20  ;;  %v1760_v55 = vadd.f32 %v1759_v44, %v1758_v5  ;;  %v1761_v1 = vpop.f32.mrb[22].mxu1 }
 0x130   : > { %v1762_v29 = vpop.f32.mrb[23].mxu1 }
 0x131   : > { %1629 = vst.msk [vmem:[%s2726_s21 + $0x60] sm:$0xff] %vm692_vm1, %v927_v27  ;;  %v928_v18 = vmul.f32 0.1, %v912_v46  ;;  %v917_v19 = vadd.f32 %v1898_v49, %v1760_v55  ;;  %v1763_v38 = vadd.f32 %v1762_v29, %v1761_v1 }
 0x133   : > { %1630 = vst.msk [vmem:[%s2726_s21 + $0x68] sm:$0xff] %vm692_vm1, %v928_v18  ;;  %v1910_v17 = vpop.f32.mrb[24].mxu0  ;;  %v929_v3 = vmul.f32 0.1, %v917_v19  ;;  %v920_v14 = vadd.f32 %v1899_v58, %v1763_v38 }
 0x134   : > { %v1131_v8 = vpop.f32.mrb[25].mxu0 }
 0x135   : > { %v1911_v12 = vpop.f32.mrb[26].mxu0  ;;  %1631 = vst.msk [vmem:[%s2726_s21 + $0x70] sm:$0xff] %vm692_vm1, %v929_v3  ;;  %v930_v36 = vmul.f32 0.1, %v920_v14  ;;  %v1788_v13 = vpop.f32.mrb[24].mxu1 }
 0x136   : > { %v1134_v48 = vpop.f32.mrb[27].mxu0  ;;  %v1789_v32 = vpop.f32.mrb[25].mxu1 }
 0x137   : > { %1632 = vst.msk [vmem:[%s2726_s21 + $0x78] sm:$0xff] %vm692_vm1, %v930_v36  ;;  %v1790_v15 = vadd.f32 %v1789_v32, %v1788_v13  ;;  %v1791_v40 = vpop.f32.mrb[26].mxu1 }
 0x138   : > { %v1792_v50 = vpop.f32.mrb[27].mxu1 }
 0x139   : > { %v1132_v30 = vadd.f32 %v1790_v15, %v1131_v8  ;;  %v1793_v4 = vadd.f32 %v1792_v50, %v1791_v40 }
 0x13b   : > { %v1914_v43 = vpop.f32.mrb[28].mxu0  ;;  %v1162_v16 = vmul.f32 0.1, %v1132_v30  ;;  %v1135_v11 = vadd.f32 %v1793_v4, %v1134_v48 }
 0x13c   : > { %v1147_v22 = vpop.f32.mrb[29].mxu0 }
 0x13d   : > { %v1915_v56 = vpop.f32.mrb[30].mxu0  ;;  %1653 = vst.msk [vmem:[%s2726_s21 + $0x80] sm:$0xff] %vm692_vm1, %v1162_v16  ;;  %v1163_v42 = vmul.f32 0.1, %v1135_v11  ;;  %v1794_v28 = vpop.f32.mrb[28].mxu1 }
 0x13e   : > { %v1150_v34 = vpop.f32.mrb[31].mxu0  ;;  %v1795_v21 = vpop.f32.mrb[29].mxu1 }
 0x13f   : > { %1654 = vst.msk [vmem:[%s2726_s21 + $0x88] sm:$0xff] %vm692_vm1, %v1163_v42  ;;  %v1796_v23 = vadd.f32 %v1795_v21, %v1794_v28  ;;  %v1797_v33 = vpop.f32.mrb[30].mxu1 }
 0x140   : > { %v1798_v45 = vpop.f32.mrb[31].mxu1 }
 0x141   : > { %v1140_v31 = vadd.f32 %v1910_v17, %v1796_v23  ;;  %v1799_v35 = vadd.f32 %v1798_v45, %v1797_v33 }
 0x143   : > { %v1164_v60 = vmul.f32 0.1, %v1140_v31  ;;  %v1143_v62 = vadd.f32 %v1911_v12, %v1799_v35 }
 0x145   : > { %1655 = vst.msk [vmem:[%s2726_s21 + $0x90] sm:$0xff] %vm692_vm1, %v1164_v60  ;;  %v1165_v9 = vmul.f32 0.1, %v1143_v62  ;;  %v1800_v63 = vpop.f32.mrb[32].mxu1 }
 0x146   : > { %v1801_v61 = vpop.f32.mrb[33].mxu1 }
 0x147   : > { %1656 = vst.msk [vmem:[%s2726_s21 + $0x98] sm:$0xff] %vm692_vm1, %v1165_v9  ;;  %v1802_v26 = vadd.f32 %v1801_v61, %v1800_v63  ;;  %v1803_v37 = vpop.f32.mrb[34].mxu1 }
 0x148   : > { %v1804_v51 = vpop.f32.mrb[35].mxu1 }
 0x149   : > { %v1805_v59 = vadd.f32 %v1804_v51, %v1803_v37  ;;  %v1148_v39 = vadd.f32 %v1802_v26, %v1147_v22 }
 0x14b   : > { %v1166_v52 = vmul.f32 0.1, %v1148_v39  ;;  %v1151_v6 = vadd.f32 %v1805_v59, %v1150_v34 }
 0x14d   : > { %1657 = vst.msk [vmem:[%s2726_s21 + $0xa0] sm:$0xff] %vm692_vm1, %v1166_v52  ;;  %v1806_v0 = vpop.f32.mrb[36].mxu1  ;;  %v1167_v7 = vmul.f32 0.1, %v1151_v6 }
 0x14e   : > { %v1807_v10 = vpop.f32.mrb[37].mxu1 }
 0x14f   : > { %1658 = vst.msk [vmem:[%s2726_s21 + $0xa8] sm:$0xff] %vm692_vm1, %v1167_v7  ;;  %v1808_v47 = vadd.f32 %v1807_v10, %v1806_v0  ;;  %v1809_v53 = vpop.f32.mrb[38].mxu1 }
 0x150   : > { %v1810_v25 = vpop.f32.mrb[39].mxu1 }
 0x151   : > { %v1156_v54 = vadd.f32 %v1914_v43, %v1808_v47  ;;  %v1811_v41 = vadd.f32 %v1810_v25, %v1809_v53 }
 0x153   : > { %v1836_v2 = vpop.f32.mrb[32].mxu0  ;;  %v1168_v49 = vmul.f32 0.1, %v1156_v54  ;;  %v1159_v24 = vadd.f32 %v1915_v56, %v1811_v41 }
 0x154   : > { %v1837_v57 = vpop.f32.mrb[33].mxu0 }
 0x155   : > { %v1838_v58 = vadd.f32 %v1837_v57, %v1836_v2  ;;  %v1839_v5 = vpop.f32.mrb[34].mxu0  ;;  %1659 = vst.msk [vmem:[%s2726_s21 + $0xb0] sm:$0xff] %vm692_vm1, %v1168_v49  ;;  %v1169_v20 = vmul.f32 0.1, %v1159_v24  ;;  %v1926_v44 = vpop.f32.mrb[40].mxu1 }
 0x156   : > { %v1840_v27 = vpop.f32.mrb[35].mxu0  ;;  %v1370_v55 = vpop.f32.mrb[41].mxu1 }
 0x157   : > { %v1841_v46 = vadd.f32 %v1840_v27, %v1839_v5  ;;  %1660 = vst.msk [vmem:[%s2726_s21 + $0xb8] sm:$0xff] %vm692_vm1, %v1169_v20  ;;  %v1371_v1 = vadd.f32 %v1838_v58, %v1370_v55  ;;  %v1927_v29 = vpop.f32.mrb[42].mxu1 }
 0x158   : > { %v1373_v18 = vpop.f32.mrb[43].mxu1 }
 0x159   : > { %v1401_v19 = vmul.f32 0.1, %v1371_v1  ;;  %v1374_v38 = vadd.f32 %v1841_v46, %v1373_v18 }
 0x15b   : > { %v1842_v17 = vpop.f32.mrb[36].mxu0  ;;  %1665 = vst.msk [vmem:[%s2726_s21 + $0xc0] sm:$0xff] %vm692_vm1, %v1401_v19  ;;  %v1402_v3 = vmul.f32 0.1, %v1374_v38 }
 0x15c   : > { %v1843_v14 = vpop.f32.mrb[37].mxu0 }
 0x15d   : > { %v1844_v8 = vadd.f32 %v1843_v14, %v1842_v17  ;;  %v1845_v12 = vpop.f32.mrb[38].mxu0  ;;  %1666 = vst.msk [vmem:[%s2726_s21 + $0xc8] sm:$0xff] %vm692_vm1, %v1402_v3  ;;  %v1930_v13 = vpop.f32.mrb[44].mxu1 }
 0x15e   : > { %v1846_v36 = vpop.f32.mrb[39].mxu0  ;;  %v1386_v15 = vpop.f32.mrb[45].mxu1 }
 0x15f   : > { %v1379_v48 = vadd.f32 %v1926_v44, %v1844_v8  ;;  %v1847_v32 = vadd.f32 %v1846_v36, %v1845_v12  ;;  %v1931_v40 = vpop.f32.mrb[46].mxu1 }
 0x160   : > { %v1389_v4 = vpop.f32.mrb[47].mxu1 }
 0x161   : > { %v1403_v50 = vmul.f32 0.1, %v1379_v48  ;;  %v1382_v30 = vadd.f32 %v1927_v29, %v1847_v32 }
 0x163   : > { %1667 = vst.msk [vmem:[%s2726_s21 + $0xd0] sm:$0xff] %vm692_vm1, %v1403_v50  ;;  %v1404_v43 = vmul.f32 0.1, %v1382_v30  ;;  %v1848_v16 = vpop.f32.mrb[40].mxu0 }
 0x164   : > { %v1849_v11 = vpop.f32.mrb[41].mxu0 }
 0x165   : > { %1668 = vst.msk [vmem:[%s2726_s21 + $0xd8] sm:$0xff] %vm692_vm1, %v1404_v43  ;;  %v1850_v22 = vadd.f32 %v1849_v11, %v1848_v16  ;;  %v1851_v56 = vpop.f32.mrb[42].mxu0 }
 0x166   : > { %v1852_v42 = vpop.f32.mrb[43].mxu0 }
 0x167   : > { %v1853_v28 = vadd.f32 %v1852_v42, %v1851_v56  ;;  %v1387_v34 = vadd.f32 %v1850_v22, %v1386_v15 }
 0x169   : > { %v1405_v21 = vmul.f32 0.1, %v1387_v34  ;;  %v1390_v23 = vadd.f32 %v1853_v28, %v1389_v4 }
 0x16b   : > { %1669 = vst.msk [vmem:[%s2726_s21 + $0xe0] sm:$0xff] %vm692_vm1, %v1405_v21  ;;  %v1406_v33 = vmul.f32 0.1, %v1390_v23  ;;  %v1854_v45 = vpop.f32.mrb[44].mxu0 }
 0x16c   : > { %v1855_v31 = vpop.f32.mrb[45].mxu0 }
 0x16d   : > { %1670 = vst.msk [vmem:[%s2726_s21 + $0xe8] sm:$0xff] %vm692_vm1, %v1406_v33  ;;  %v1856_v35 = vadd.f32 %v1855_v31, %v1854_v45  ;;  %v1857_v60 = vpop.f32.mrb[46].mxu0 }
 0x16e   : > { %v1858_v62 = vpop.f32.mrb[47].mxu0 }
 0x16f   : > { %v1395_v9 = vadd.f32 %v1930_v13, %v1856_v35  ;;  %v1859_v63 = vadd.f32 %v1858_v62, %v1857_v60 }
 0x171   : > { %v1407_v61 = vmul.f32 0.1, %v1395_v9  ;;  %v1398_v26 = vadd.f32 %v1931_v40, %v1859_v63 }
 0x173   : > { %1671 = vst.msk [vmem:[%s2726_s21 + $0xf0] sm:$0xff] %vm692_vm1, %v1407_v61  ;;  %v1408_v37 = vmul.f32 0.1, %v1398_v26 }
 0x175   : > { %1672 = vst.msk [vmem:[%s2726_s21 + $0xf8] sm:$0xff] %vm692_vm1, %v1408_v37 }
 0x176 PF: > { %s13_s14 = sadd.s32 1, %s2000_s14   ;;  %s2986_s12 = smov %s1996_s13 }
 0x177   : > { %p10_p5 = scmp.ge.s32.totalorder %s13_s14, 4   ;;  %s2987_s13 = smov %s2989_s15 }
 0x179   :  { %12 = sbr.rel (!%p10_p5) target bundleno = 2 (0x2), region = 72 }

</bundles_post_ra>
